<compile_context>
chip_gen: v7x
topology: tpu7x:2x2x1
jax: 0.10.0
libtpu: 0.0.40
codegen_flags: <defaults>
</compile_context>

<pallas_src>
import jax
import jax.numpy as jnp
from jax.experimental import pallas as pl
from jax.experimental.pallas import tpu as pltpu


_POOL_CHUNK = 8  # sublane rows summed per step of the in-kernel pooling loop


def _head_kernel(x_ref, w1_ref, b1_ref, w2_ref, b2_ref, out_ref, acc_ref):
    """One (batch-tile, hw-tile) grid step of the ft_net_dense head."""
    hw_i = pl.program_id(1)

    @pl.when(hw_i == 0)
    def _init():
        acc_ref[...] = jnp.zeros_like(acc_ref)

    # Spatial partial sum with f32 accumulation.  Summing 8 sublane rows at a
    # time keeps any f32 temporary at (tb, 8, 1024) (< 2 MiB) instead of a
    # full (tb, hw_tile, 1024) f32 copy of the bf16 tile.
    n_chunks = x_ref.shape[1] // _POOL_CHUNK
    part = jnp.zeros(acc_ref.shape, jnp.float32)
    for c in range(n_chunks):  # tiny static trip count (<= 8)
        blk = x_ref[:, c * _POOL_CHUNK:(c + 1) * _POOL_CHUNK, :].astype(jnp.float32)
        part = part + jnp.sum(blk, axis=1)
    acc_ref[...] += part

    @pl.when(hw_i == pl.num_programs(1) - 1)
    def _finalize():
        # BatchNorm1d (eval running stats) and 1/HW are folded into w1/b1 in
        # the wrapper, so acc_ref holds the raw spatial sum.  Matmuls run on
        # bf16 operands (native MXU dtype) with f32 accumulation.
        pooled = acc_ref[...].astype(jnp.bfloat16)                        # (tb, 1024)
        y = jnp.dot(pooled, w1_ref[...],
                    preferred_element_type=jnp.float32) + b1_ref[...]     # (tb, 512)
        y = jnp.where(y >= 0.0, y, 0.1 * y)                               # LeakyReLU(0.1)
        # Dropout(p=0.5) is identity in eval mode.
        out = jnp.dot(y.astype(jnp.bfloat16), w2_ref[...],
                      preferred_element_type=jnp.float32) + b2_ref[...]   # (tb, cp)
        out_ref[...] = out.astype(out_ref.dtype)


def ft_net_dense_head(feat_nhwc, params, class_num, *, batch_tile=64,
                      bn_eps=1e-5, vmem_limit_bytes=48 * 1024 * 1024):
    """avgpool + fc block + classifier head of ft_net_dense.

    feat_nhwc: (B, H, W, 1024) channels-last densenet feature map
               (bf16 preferred; f32 is cast once).
    """
    B, H, W, C = feat_nhwc.shape
    assert C == 1024, "ft_net_dense head expects 1024-channel densenet features"
    HW = H * W
    nb = params["w1"].shape[1]  # 512 bottleneck

    # Channels-last reshape is layout-free (no HBM transpose); bf16 halves the
    # dominant HBM stream.
    x = feat_nhwc.reshape(B, HW, C)
    if x.dtype != jnp.bfloat16:
        x = x.astype(jnp.bfloat16)

    # Fold BatchNorm1d (eval) *and* the 1/HW average into the first Linear.
    scale = params["gamma"] * jax.lax.rsqrt(params["running_var"] + bn_eps)   # (1, 512)
    w1f = (params["w1"] * scale * (1.0 / HW)).astype(jnp.bfloat16)            # (1024, 512)
    b1f = ((params["b1"] - params["running_mean"]) * scale
           + params["beta"]).astype(jnp.float32)                              # (1, 512)

    # Lane-pad classifier columns to a multiple of 128 -> unmasked stores.
    cp = ((class_num + 127) // 128) * 128
    w2, b2 = params["w2"], params["b2"]
    if cp != class_num:
        w2 = jnp.pad(w2, ((0, 0), (0, cp - class_num)))
        b2 = jnp.pad(b2, ((0, 0), (0, cp - class_num)))
    w2 = w2.astype(jnp.bfloat16)
    b2 = b2.astype(jnp.float32)

    # Batch tiling.  For B >= 16 force at least 2 grid steps on the "parallel"
    # batch axis (sublane-aligned tiles) so v7x's two TensorCores both work.
    tb = max(1, min(batch_tile, B))
    if B >= 16:
        half = ((pl.cdiv(B, 2) + 7) // 8) * 8
        tb = max(8, (min(tb, half) // 8) * 8)
    nblk = pl.cdiv(B, tb)
    bp = nblk * tb

    # Spatial tiling: sublane-pad HW and split it over an innermost
    # "arbitrary" grid axis whenever the bf16 feature tile would exceed
    # ~8 MiB, so VMEM stays bounded at any input resolution.
    hw_tile = ((HW + 7) // 8) * 8
    max_tile_bytes = 8 * 1024 * 1024
    while tb * hw_tile * C * 2 > max_tile_bytes and hw_tile > 8:
        hw_tile = ((hw_tile // 2 + 7) // 8) * 8
    n_hw = pl.cdiv(((HW + 7) // 8) * 8, hw_tile)
    hw_pad = n_hw * hw_tile

    if (bp, hw_pad) != (B, HW):
        x = jnp.pad(x, ((0, bp - B), (0, hw_pad - HW), (0, 0)))

    # Advisory cost so XLA can overlap this memory-bound head with the
    # densenet backbone tail instead of serializing.
    cost = pl.CostEstimate(
        flops=2 * B * (HW * C + C * nb + nb * cp),
        transcendentals=0,
        bytes_accessed=B * HW * C * 2 + (C * nb + nb * cp) * 2 + B * cp * 4,
    )

    out = pl.pallas_call(
        _head_kernel,
        out_shape=jax.ShapeDtypeStruct((bp, cp), jnp.float32),
        grid=(nblk, n_hw),
        in_specs=[
            # Feature map: the only large HBM stream, double-buffered per tile.
            pl.BlockSpec((tb, hw_tile, C), lambda i, j: (i, j, 0)),
            # Weights / biases: constant block index -> fetched once, VMEM-resident
            # (bf16 keeps even default double-buffering at ~2.3 MiB total).
            pl.BlockSpec((C, nb), lambda i, j: (0, 0)),
            pl.BlockSpec((1, nb), lambda i, j: (0, 0)),
            pl.BlockSpec((nb, cp), lambda i, j: (0, 0)),
            pl.BlockSpec((1, cp), lambda i, j: (0, 0)),
        ],
        out_specs=pl.BlockSpec((tb, cp), lambda i, j: (i, 0)),
        scratch_shapes=[pltpu.VMEM((tb, C), jnp.float32)],
        compiler_params=pltpu.CompilerParams(
            dimension_semantics=("parallel", "arbitrary"),
            vmem_limit_bytes=vmem_limit_bytes),
        cost_estimate=cost,
    )(x, w1f, b1f, w2, b2)

    return out[:B, :class_num]


def init_params(key, class_num):
    """Deterministic init mirroring weights_init_kaiming / weights_init_classifier."""
    k1, k2, k3 = jax.random.split(key, 3)
    num_bottleneck = 512
    # Linear(1024, 512): kaiming_normal(mode='fan_out') -> std = sqrt(2/512); bias 0.
    # Stored pre-transposed as (in, out) for the kernel matmul.
    w1 = jax.random.normal(k1, (1024, num_bottleneck), jnp.float32) * (2.0 / num_bottleneck) ** 0.5
    b1 = jnp.zeros((1, num_bottleneck), jnp.float32)
    # BatchNorm1d(512): weight ~ N(1, 0.02), bias = 0, default running stats.
    gamma = 1.0 + 0.02 * jax.random.normal(k2, (1, num_bottleneck), jnp.float32)
    beta = jnp.zeros((1, num_bottleneck), jnp.float32)
    running_mean = jnp.zeros((1, num_bottleneck), jnp.float32)
    running_var = jnp.ones((1, num_bottleneck), jnp.float32)
    # classifier Linear(512, class_num): weight ~ N(0, 0.001), bias = 0.
    w2 = 0.001 * jax.random.normal(k3, (num_bottleneck, class_num), jnp.float32)
    b2 = jnp.zeros((1, class_num), jnp.float32)
    return {
        "w1": w1, "b1": b1,
        "gamma": gamma, "beta": beta,
        "running_mean": running_mean, "running_var": running_var,
        "w2": w2, "b2": b2,
    }


if __name__ == "__main__":
    key = jax.random.PRNGKey(0)
    k_feat, k_param = jax.random.split(key)

    # Small, module-consistent shapes: densenet121 features always have 1024
    # channels; tiny 4x4 spatial map, batch=2.  class_num=130 exercises the
    # lane-padding (not a multiple of 128) path.
    B, H, W, C = 2, 4, 4, 1024
    class_num = 130

    # Channels-last bf16 feature map (as the backbone would ideally emit it).
    feats = jax.random.normal(k_feat, (B, H, W, C), jnp.float32).astype(jnp.bfloat16)
    params = init_params(k_param, class_num)

    out = ft_net_dense_head(feats, params, class_num)
    out = jax.block_until_ready(out)
    assert out.shape == (B, class_num)
    assert out.dtype == jnp.float32
    assert bool(jnp.all(jnp.isfinite(out)))

    # Pure-JAX eval-mode reference for a quick numerical sanity check.
    pooled = jnp.mean(feats.astype(jnp.float32).reshape(B, H * W, C), axis=1)
    scale = params["gamma"] / jnp.sqrt(params["running_var"] + 1e-5)
    y = (pooled @ params["w1"] + params["b1"] - params["running_mean"]) * scale + params["beta"]
    y = jnp.where(y >= 0, y, 0.1 * y)
    ref = y @ params["w2"] + params["b2"]
    err = jnp.max(jnp.abs(out - ref))
    assert bool(err < 1e-2 + 1e-2 * jnp.max(jnp.abs(ref))), f"max abs err {err}"

    print("KERNEL_OK")
</pallas_src>

<mosaic_0001>
module attributes {stable_mosaic.version = 11 : i64} {
  func.func @_head_kernel(%arg0: i32, %arg1: i32, %arg2: memref<2x16x1024xbf16, #tpu.memory_space<vmem>>, %arg3: memref<1024x512xbf16, #tpu.memory_space<vmem>>, %arg4: memref<1x512xf32, #tpu.memory_space<vmem>>, %arg5: memref<512x256xbf16, #tpu.memory_space<vmem>>, %arg6: memref<1x256xf32, #tpu.memory_space<vmem>>, %arg7: memref<2x256xf32, #tpu.memory_space<vmem>>, %arg8: memref<2x1024xf32, #tpu.memory_space<vmem>>) attributes {dimension_semantics = [#tpu.dimension_semantics<parallel>, #tpu.dimension_semantics<arbitrary>], iteration_bounds = array<i64: 1, 1>, scalar_prefetch = 0 : i64, scratch_operands = 1 : i64, tpu.core_type = #tpu.core_type<tc>, window_params = [{transform_indices = @transform_0, window_bounds = array<i64: 2, 16, 1024>}, {pipeline_mode = #tpu.pipeline_mode<synchronous>, transform_indices = @transform_1, window_bounds = array<i64: 1024, 512>}, {pipeline_mode = #tpu.pipeline_mode<synchronous>, transform_indices = @transform_2, window_bounds = array<i64: 1, 512>}, {pipeline_mode = #tpu.pipeline_mode<synchronous>, transform_indices = @transform_3, window_bounds = array<i64: 512, 256>}, {pipeline_mode = #tpu.pipeline_mode<synchronous>, transform_indices = @transform_4, window_bounds = array<i64: 1, 256>}, {transform_indices = @transform_5, window_bounds = array<i64: 2, 256>}]} {
    %c0_i32 = arith.constant 0 : i32
    %0 = arith.cmpi eq, %arg1, %c0_i32 : i32
    %1 = arith.extui %0 : i1 to i32
    %c0_i32_0 = arith.constant 0 : i32
    %2 = arith.cmpi ne, %1, %c0_i32_0 : i32
    scf.if %2 {
      %cst_13 = arith.constant 0.000000e+00 : f32
      %18 = vector.broadcast %cst_13 : f32 to vector<2x1024xf32>
      %c0_14 = arith.constant 0 : index
      %c0_15 = arith.constant 0 : index
      %19 = vector.load %arg8[%c0_14, %c0_15] : memref<2x1024xf32, #tpu.memory_space<vmem>>, vector<2x1024xf32>
      tpu.vector_store %arg8[%c0_14, %c0_15], %18 {strides = array<i32>} : memref<2x1024xf32, #tpu.memory_space<vmem>>, vector<2x1024xf32>,
    } else {
    }
    %cst = arith.constant 0.000000e+00 : f32
    %3 = vector.broadcast %cst : f32 to vector<2x1024xf32>
    %c0 = arith.constant 0 : index
    %c0_1 = arith.constant 0 : index
    %c0_2 = arith.constant 0 : index
    %4 = vector.load %arg2[%c0, %c0_1, %c0_2] : memref<2x16x1024xbf16, #tpu.memory_space<vmem>>, vector<2x8x1024xbf16>
    %5 = arith.extf %4 : vector<2x8x1024xbf16> to vector<2x8x1024xf32>
    %cst_3 = arith.constant dense<0.000000e+00> : vector<2x1024xf32>
    %6 = vector.multi_reduction <add>, %5, %cst_3 [1] : vector<2x8x1024xf32> to vector<2x1024xf32>
    %7 = arith.addf %3, %6 : vector<2x1024xf32>
    %c0_4 = arith.constant 0 : index
    %c8 = arith.constant 8 : index
    %c0_5 = arith.constant 0 : index
    %8 = vector.load %arg2[%c0_4, %c8, %c0_5] : memref<2x16x1024xbf16, #tpu.memory_space<vmem>>, vector<2x8x1024xbf16>
    %9 = arith.extf %8 : vector<2x8x1024xbf16> to vector<2x8x1024xf32>
    %cst_6 = arith.constant dense<0.000000e+00> : vector<2x1024xf32>
    %10 = vector.multi_reduction <add>, %9, %cst_6 [1] : vector<2x8x1024xf32> to vector<2x1024xf32>
    %11 = arith.addf %7, %10 : vector<2x1024xf32>
    %c0_7 = arith.constant 0 : index
    %c0_8 = arith.constant 0 : index
    %12 = vector.load %arg8[%c0_7, %c0_8] : memref<2x1024xf32, #tpu.memory_space<vmem>>, vector<2x1024xf32>
    %13 = arith.addf %12, %11 : vector<2x1024xf32>
    %c0_9 = arith.constant 0 : index
    %c0_10 = arith.constant 0 : index
    %14 = vector.load %arg8[%c0_9, %c0_10] : memref<2x1024xf32, #tpu.memory_space<vmem>>, vector<2x1024xf32>
    tpu.vector_store %arg8[%c0_9, %c0_10], %13 {strides = array<i32>} : memref<2x1024xf32, #tpu.memory_space<vmem>>, vector<2x1024xf32>,
    %c0_i32_11 = arith.constant 0 : i32
    %15 = arith.cmpi eq, %arg1, %c0_i32_11 : i32
    %16 = arith.extui %15 : i1 to i32
    %c0_i32_12 = arith.constant 0 : i32
    %17 = arith.cmpi ne, %16, %c0_i32_12 : i32
    scf.if %17 {
      %c0_13 = arith.constant 0 : index
      %c0_14 = arith.constant 0 : index
      %18 = vector.load %arg8[%c0_13, %c0_14] : memref<2x1024xf32, #tpu.memory_space<vmem>>, vector<2x1024xf32>
      %19 = arith.truncf %18 : vector<2x1024xf32> to vector<2x1024xbf16>
      %c0_15 = arith.constant 0 : index
      %c0_16 = arith.constant 0 : index
      %20 = vector.load %arg3[%c0_15, %c0_16] : memref<1024x512xbf16, #tpu.memory_space<vmem>>, vector<1024x512xbf16>
      %cst_17 = arith.constant dense<0.000000e+00> : vector<2x512xf32>
      %21 = tpu.matmul %19, %20, %cst_17 {dimension_numbers = #tpu.dot_dimension_numbers<[1], [0], [0], [1], [0, 0, 1, 1], [], []>} : vector<2x1024xbf16>, vector<1024x512xbf16>, vector<2x512xf32> -> vector<2x512xf32>
      %c0_18 = arith.constant 0 : index
      %c0_19 = arith.constant 0 : index
      %22 = vector.load %arg4[%c0_18, %c0_19] : memref<1x512xf32, #tpu.memory_space<vmem>>, vector<1x512xf32>
      %23 = vector.broadcast %22 : vector<1x512xf32> to vector<2x512xf32>
      %24 = arith.addf %21, %23 : vector<2x512xf32>
      %cst_20 = arith.constant 0.000000e+00 : f32
      %25 = vector.broadcast %cst_20 : f32 to vector<2x512xf32>
      %26 = arith.cmpf oge, %24, %25 : vector<2x512xf32>
      %cst_21 = arith.constant 1.000000e-01 : f32
      %27 = vector.broadcast %cst_21 : f32 to vector<2x512xf32>
      %28 = arith.mulf %27, %24 : vector<2x512xf32>
      %29 = arith.select %26, %24, %28 : vector<2x512xi1>, vector<2x512xf32>
      %30 = arith.truncf %29 : vector<2x512xf32> to vector<2x512xbf16>
      %c0_22 = arith.constant 0 : index
      %c0_23 = arith.constant 0 : index
      %31 = vector.load %arg5[%c0_22, %c0_23] : memref<512x256xbf16, #tpu.memory_space<vmem>>, vector<512x256xbf16>
      %cst_24 = arith.constant dense<0.000000e+00> : vector<2x256xf32>
      %32 = tpu.matmul %30, %31, %cst_24 {dimension_numbers = #tpu.dot_dimension_numbers<[1], [0], [0], [1], [0, 0, 1, 1], [], []>} : vector<2x512xbf16>, vector<512x256xbf16>, vector<2x256xf32> -> vector<2x256xf32>
      %c0_25 = arith.constant 0 : index
      %c0_26 = arith.constant 0 : index
      %33 = vector.load %arg6[%c0_25, %c0_26] : memref<1x256xf32, #tpu.memory_space<vmem>>, vector<1x256xf32>
      %34 = vector.broadcast %33 : vector<1x256xf32> to vector<2x256xf32>
      %35 = arith.addf %32, %34 : vector<2x256xf32>
      %c0_27 = arith.constant 0 : index
      %c0_28 = arith.constant 0 : index
      %36 = vector.load %arg7[%c0_27, %c0_28] : memref<2x256xf32, #tpu.memory_space<vmem>>, vector<2x256xf32>
      tpu.vector_store %arg7[%c0_27, %c0_28], %35 {strides = array<i32>} : memref<2x256xf32, #tpu.memory_space<vmem>>, vector<2x256xf32>,
    } else {
    }
    return
  }
  func.func @transform_0(%arg0: i32, %arg1: i32) -> (i32, i32, i32) {
    %c0_i32 = arith.constant 0 : i32
    %c0_i32_0 = arith.constant 0 : i32
    return %arg0, %arg1, %c0_i32 : i32, i32, i32
  }
  func.func @transform_1(%arg0: i32, %arg1: i32) -> (i32, i32) {
    %c0_i32 = arith.constant 0 : i32
    %c0_i32_0 = arith.constant 0 : i32
    %c0_i32_1 = arith.constant 0 : i32
    return %c0_i32, %c0_i32_0 : i32, i32
  }
  func.func @transform_2(%arg0: i32, %arg1: i32) -> (i32, i32) {
    %c0_i32 = arith.constant 0 : i32
    %c0_i32_0 = arith.constant 0 : i32
    %c0_i32_1 = arith.constant 0 : i32
    return %c0_i32, %c0_i32_0 : i32, i32
  }
  func.func @transform_3(%arg0: i32, %arg1: i32) -> (i32, i32) {
    %c0_i32 = arith.constant 0 : i32
    %c0_i32_0 = arith.constant 0 : i32
    %c0_i32_1 = arith.constant 0 : i32
    return %c0_i32, %c0_i32_0 : i32, i32
  }
  func.func @transform_4(%arg0: i32, %arg1: i32) -> (i32, i32) {
    %c0_i32 = arith.constant 0 : i32
    %c0_i32_0 = arith.constant 0 : i32
    %c0_i32_1 = arith.constant 0 : i32
    return %c0_i32, %c0_i32_0 : i32, i32
  }
  func.func @transform_5(%arg0: i32, %arg1: i32) -> (i32, i32) {
    %c0_i32 = arith.constant 0 : i32
    %c0_i32_0 = arith.constant 0 : i32
    return %arg0, %c0_i32 : i32, i32
  }
}

</mosaic_0001>

<bundles_post_ra>
// kernel: tpu_custom_call.1
= control target key start
LH: loop header
LB: loop body
LE: loop exit
PB: predicated region body
PF: predicated region fallthrough
CT: control target
= control target key end

     0   :  { %10 = vsyncpa [#allocation4], 0  ;;  %s4083_s0 = inlined_call_operand.hbm [shape: bf16[2,16,1024], index: 0, kind: input, shape index: {}]   ;;  %s4084_s1 = inlined_call_operand.hbm [shape: bf16[1024,512], index: 1, kind: input, shape index: {}]   ;;  %s4085_s2 = inlined_call_operand.vmem [shape: f32[1,512], index: 2, kind: input, shape index: {}]   ;;  %s4086_s3 = inlined_call_operand.hbm [shape: bf16[512,256], index: 3, kind: input, shape index: {}]   ;;  %s4087_s4 = inlined_call_operand.vmem [shape: f32[1,256], index: 4, kind: input, shape index: {}]   ;;  %s4088_s5 = inlined_call_operand.hbm [shape: f32[2,256], index: 5, kind: output, shape index: {}]  }
   0x1   :  { %11 = vsyncpa [#allocation7], 0 }
   0x2   :  { %12 = vsyncpa [#allocation5], 0  ;;  %s3855_s18 = smov [#allocation6]   ;;  %s3761_s22 = scalar_lea.hbm %s4084_s1, 32768 }
   0x3   :  { %s30_s19 = sshll.u32 %s3855_s18, 4  ;;  %p3762_p0 = scmp.ne.s32.totalorder %s4084_s1, %s3761_s22  ;;  %s31_s19 = int_to_ptr.vmem [resolvable:$true] %s30_s19 }
   0x4   :  { %p3765_p1 = scmp.lt.u32.totalorder %s3761_s22, %s4084_s1 }
   0x6   :  { %p3767_p2 = pnand %p3765_p1, %p3762_p0 }
   0x8   :  { %3770 = shalt.err (!%p3767_p2)
}
   0x9   :  { %s3771_s27 = scalar_lea.vmem %s31_s19, 32768  ;;  %p3776_p4 = scmp.lt.s32.totalorder %s31_s19, %s31_s19 }
   0xa   :  { %p3772_p3 = scmp.ne.s32.totalorder %s31_s19, %s3771_s27  ;;  %p3777_p5 = scmp.lt.s32.totalorder %s3771_s27, %s3771_s27 }
   0xc   :  { %p3778_p6 = por %p3777_p5, %p3776_p4 }
   0xe   :  { %p3779_p7 = pnand %p3778_p6, %p3772_p3 }
  0x10   :  { %3782 = shalt.err (!%p3779_p7)
}
  0x11   :  { %s3856_s28 = smov 256   ;;  %s3857_s29 = smov 16  }
  0x12   :  { %36 = dma.hbm_to_vmem [thread:$0]  %s4084_s1, 32768, %s31_s19, [#allocation7], %s3856_s28, %s3856_s28, %s3857_s29  }
  0x13   :  { %s3858_s7 = smov [#allocation3]   ;;  %s3783_s11 = scalar_lea.hbm %s4083_s0, 2048 }
  0x14   :  { %s18_s8 = sshll.u32 %s3858_s7, 4  ;;  %p3784_p8 = scmp.ne.s32.totalorder %s4083_s0, %s3783_s11  ;;  %s19_s8 = int_to_ptr.vmem [resolvable:$true] %s18_s8 }
  0x15   :  { %p3787_p9 = scmp.lt.u32.totalorder %s3783_s11, %s4083_s0 }
  0x17   :  { %p3789_p10 = pnand %p3787_p9, %p3784_p8 }
  0x19   :  { %3792 = shalt.err (!%p3789_p10)
}
  0x1a   :  { %s3793_s16 = scalar_lea.vmem %s19_s8, 2048  ;;  %p3798_p12 = scmp.lt.s32.totalorder %s19_s8, %s19_s8 }
  0x1b   :  { %p3794_p11 = scmp.ne.s32.totalorder %s19_s8, %s3793_s16  ;;  %p3799_p13 = scmp.lt.s32.totalorder %s3793_s16, %s3793_s16 }
  0x1d   :  { %p3800_p0 = por %p3799_p13, %p3798_p12 }
  0x1f   :  { %p3801_p1 = pnand %p3800_p0, %p3794_p11 }
  0x21   :  { %3804 = shalt.err (!%p3801_p1)
}
  0x22   :  { %s3859_s1 = smov 512   ;;  %s3860_s17 = smov 32  }
  0x23   :  { %24 = dma.hbm_to_vmem [thread:$0]  %s4083_s0, 2048, %s19_s8, [#allocation4], %s3859_s1, %s3859_s1, %s3860_s17  }
  0x24   :  { %s3861_s20 = smov [#allocation8]   ;;  %s3805_s24 = scalar_lea.hbm %s4086_s3, 8192 }
  0x25   :  { %s44_s21 = sshll.u32 %s3861_s20, 4  ;;  %p3806_p2 = scmp.ne.s32.totalorder %s4086_s3, %s3805_s24  ;;  %s45_s21 = int_to_ptr.vmem [resolvable:$true] %s44_s21 }
  0x26   :  { %p3809_p3 = scmp.lt.u32.totalorder %s3805_s24, %s4086_s3 }
  0x28   :  { %p3811_p4 = pnand %p3809_p3, %p3806_p2 }
  0x2a   :  { %3814 = shalt.err (!%p3811_p4)
}
  0x2b   :  { %s3815_s29 = scalar_lea.vmem %s45_s21, 8192  ;;  %p3820_p6 = scmp.lt.s32.totalorder %s45_s21, %s45_s21 }
  0x2c   :  { %p3816_p5 = scmp.ne.s32.totalorder %s45_s21, %s3815_s29  ;;  %p3821_p7 = scmp.lt.s32.totalorder %s3815_s29, %s3815_s29 }
  0x2e   :  { %p3822_p8 = por %p3821_p7, %p3820_p6 }
  0x30   :  { %p3823_p9 = pnand %p3822_p8, %p3816_p5 }
  0x32   :  { %3826 = shalt.err (!%p3823_p9)
}
  0x33   :  { %s3862_s0 = smov 128   ;;  %s3863_s30 = smov 8  }
  0x34   :  { %50 = dma.hbm_to_vmem [thread:$0]  %s4086_s3, 8192, %s45_s21, [#allocation7], %s3862_s0, %s3862_s0, %s3863_s30  }
  0x35   :  { %3849 = dma.done.wait [#allocation4], 2048  }
  0x36   :  { %3850 = vsyncadd [#allocation4], 4294965248 }
  0x37   :  { %3851 = dma.done.wait [#allocation7], 40960  }
  0x38   :  { %3852 = vsyncadd [#allocation7], 4294926336  ;;  %v3281_v0 = vld [vmem:[#allocation6 + $0x4] ss:$16 sps:$4 sm:$0xff]   ;;  %v3285_v2 = vld [vmem:[#allocation6] ss:$16 sps:$4 sm:$0xff]   ;;  %v363_v41 = vlaneseq }
  0x39   :  { %v3283_v1 = vld [vmem:[#allocation6 + $0x204] ss:$16 sps:$4 sm:$0xff]   ;;  %2067 = vmatprep.subr.bf16.mxu1 %v3281_v0  ;;  %v3286_v3 = vld [vmem:[#allocation6 + $0x200] ss:$16 sps:$4 sm:$0xff]   ;;  %v3864_v39 = vmov 1983009808  }
  0x3a   :  { %2108 = vmatprep.subr.bf16.mxu0 %v3283_v1  ;;  %v3287_v4 = vld [vmem:[#allocation6 + $0x24] ss:$16 sps:$4 sm:$0xff]   ;;  %2068 = vmatpush1.bf16.msra.mxu1 %v3285_v2  ;;  %v3291_v6 = vld [vmem:[#allocation6 + $0x20] ss:$16 sps:$4 sm:$0xff]   ;;  %v361_v40 = vunpack.c.l.s4 %v3864_v39  ;;  %v3932_v48 = vshrl.u32 %v363_v41, 7  ;;  %v69_v53 = vld [vmem:[#allocation3 + $0x8] sm:$0xff] }
  0x3b   :  { %2109 = vmatpush1.bf16.msra.mxu0 %v3286_v3  ;;  %v3289_v5 = vld [vmem:[#allocation6 + $0x224] ss:$16 sps:$4 sm:$0xff]   ;;  %2069 = vmatprep.subr.bf16.mxu1 %v3287_v4  ;;  %v3292_v7 = vld [vmem:[#allocation6 + $0x220] ss:$16 sps:$4 sm:$0xff]   ;;  %v73_v55 = vld [vmem:[#allocation3 + $0x48] sm:$0xff]  ;;  %v78_v62 = vunpack.c.l.bf16 %v69_v53  ;;  %v79_v63 = vunpack.c.h.bf16 %v69_v53  ;;  %vm431_vm0 = vcmask 1041409  }
  0x3c   :  { %2110 = vmatprep.subr.bf16.mxu0 %v3289_v5  ;;  %v3293_v8 = vld [vmem:[#allocation6 + $0x44] ss:$16 sps:$4 sm:$0xff]   ;;  %v3297_v10 = vld [vmem:[#allocation6 + $0x40] ss:$16 sps:$4 sm:$0xff]   ;;  %v362_v47 = vunpack.c.0.s8 %v361_v40  ;;  %v86_v2 = vunpack.c.l.bf16 %v73_v55  ;;  %v87_v3 = vunpack.c.h.bf16 %v73_v55  ;;  %v205_v53 = vld [vmem:[#allocation3 + $0x28] sm:$0xff]  ;;  %vm433_vm1 = vcmask 1043459  }
  0x3d   :  { %v3295_v9 = vld [vmem:[#allocation6 + $0x244] ss:$16 sps:$4 sm:$0xff]   ;;  %v3298_v11 = vld [vmem:[#allocation6 + $0x240] ss:$16 sps:$4 sm:$0xff]   ;;  %vm435_vm2 = vcmask 1045509   ;;  %vm437_vm3 = vcmask 1047559  }
  0x3e   :  { %2070 = vmatpush1.bf16.msra.mxu1 %v3291_v6  ;;  %v3299_v12 = vld [vmem:[#allocation6 + $0x64] ss:$16 sps:$4 sm:$0xff]   ;;  %v3303_v14 = vld [vmem:[#allocation6 + $0x60] ss:$16 sps:$4 sm:$0xff]   ;;  %v3935_v58 = vsub.s32 %v362_v47, %v3932_v48  ;;  %s3865_s10 = smov [#allocation9]  }
  0x3f   :  { %2111 = vmatpush1.bf16.msra.mxu0 %v3292_v7  ;;  %2071 = vmatprep.subr.bf16.mxu1 %v3293_v8  ;;  %v3301_v13 = vld [vmem:[#allocation6 + $0x264] ss:$16 sps:$4 sm:$0xff]   ;;  %v3304_v15 = vld [vmem:[#allocation6 + $0x260] ss:$16 sps:$4 sm:$0xff]   ;;  %v104_v7 = vrot.slane %v78_v62, 4  ;;  %v110_v8 = vrot.slane %v79_v63, 4 }
  0x40   :  { %2112 = vmatprep.subr.bf16.mxu0 %v3295_v9  ;;  %v3305_v16 = vld [vmem:[#allocation6 + $0x84] ss:$16 sps:$4 sm:$0xff]   ;;  %v3309_v18 = vld [vmem:[#allocation6 + $0x80] ss:$16 sps:$4 sm:$0xff]   ;;  %s2907_s11 = sshll.u32 %s3865_s10, 4  ;;  %s2908_s11 = int_to_ptr.vmem [resolvable:$true] %s2907_s11 }
  0x41   :  { %v3307_v17 = vld [vmem:[#allocation6 + $0x284] ss:$16 sps:$4 sm:$0xff]   ;;  %v3310_v19 = vld [vmem:[#allocation6 + $0x280] ss:$16 sps:$4 sm:$0xff]   ;;  %s3827_s12 = scalar_lea.vmem %s2908_s11, 64  ;;  %p3832_p11 = scmp.lt.s32.totalorder %s2908_s11, %s2908_s11 }
  0x42   :  { %2072 = vmatpush1.bf16.msra.mxu1 %v3297_v10  ;;  %v3311_v20 = vld [vmem:[#allocation6 + $0xa4] ss:$16 sps:$4 sm:$0xff]   ;;  %v3315_v22 = vld [vmem:[#allocation6 + $0xa0] ss:$16 sps:$4 sm:$0xff]   ;;  %p3828_p10 = scmp.ne.s32.totalorder %s2908_s11, %s3827_s12  ;;  %p3833_p12 = scmp.lt.s32.totalorder %s3827_s12, %s3827_s12 }
  0x43   :  { %2113 = vmatpush1.bf16.msra.mxu0 %v3298_v11  ;;  %2073 = vmatprep.subr.bf16.mxu1 %v3299_v12  ;;  %v3313_v21 = vld [vmem:[#allocation6 + $0x2a4] ss:$16 sps:$4 sm:$0xff]   ;;  %v3316_v23 = vld [vmem:[#allocation6 + $0x2a0] ss:$16 sps:$4 sm:$0xff]  }
  0x44   :  { %2114 = vmatprep.subr.bf16.mxu0 %v3301_v13  ;;  %v3317_v24 = vld [vmem:[#allocation6 + $0xc4] ss:$16 sps:$4 sm:$0xff]   ;;  %v3321_v26 = vld [vmem:[#allocation6 + $0xc0] ss:$16 sps:$4 sm:$0xff]   ;;  %p3834_p13 = por %p3833_p12, %p3832_p11 }
  0x45   :  { %v3319_v25 = vld [vmem:[#allocation6 + $0x2c4] ss:$16 sps:$4 sm:$0xff]   ;;  %v3322_v27 = vld [vmem:[#allocation6 + $0x2c0] ss:$16 sps:$4 sm:$0xff]  }
  0x46   :  { %2074 = vmatpush1.bf16.msra.mxu1 %v3303_v14  ;;  %v3323_v28 = vld [vmem:[#allocation6 + $0xe4] ss:$16 sps:$4 sm:$0xff]   ;;  %v3327_v30 = vld [vmem:[#allocation6 + $0xe0] ss:$16 sps:$4 sm:$0xff]   ;;  %v152_v14 = vrot.slane %v86_v2, 4  ;;  %p3835_p0 = pnand %p3834_p13, %p3828_p10 }
  0x47   :  { %2115 = vmatpush1.bf16.msra.mxu0 %v3304_v15  ;;  %2075 = vmatprep.subr.bf16.mxu1 %v3305_v16  ;;  %v3325_v29 = vld [vmem:[#allocation6 + $0x2e4] ss:$16 sps:$4 sm:$0xff]   ;;  %v3328_v31 = vld [vmem:[#allocation6 + $0x2e0] ss:$16 sps:$4 sm:$0xff]   ;;  %v158_v15 = vrot.slane %v87_v3, 4 }
  0x48   :  { %2116 = vmatprep.subr.bf16.mxu0 %v3307_v17  ;;  %v3329_v32 = vld [vmem:[#allocation6 + $0x104] ss:$16 sps:$4 sm:$0xff]   ;;  %v3333_v34 = vld [vmem:[#allocation6 + $0x100] ss:$16 sps:$4 sm:$0xff]  }
  0x49   :  { %v3331_v33 = vld [vmem:[#allocation6 + $0x304] ss:$16 sps:$4 sm:$0xff]   ;;  %v3334_v35 = vld [vmem:[#allocation6 + $0x300] ss:$16 sps:$4 sm:$0xff]  }
  0x4a   :  { %2076 = vmatpush1.bf16.msra.mxu1 %v3309_v18  ;;  %v3335_v36 = vld [vmem:[#allocation6 + $0x124] ss:$16 sps:$4 sm:$0xff]   ;;  %v3339_v38 = vld [vmem:[#allocation6 + $0x120] ss:$16 sps:$4 sm:$0xff]   ;;  %v105_v18 = vadd.f32 %v104_v7, %v78_v62 }
  0x4b   :  { %2117 = vmatpush1.bf16.msra.mxu0 %v3310_v19  ;;  %2077 = vmatprep.subr.bf16.mxu1 %v3311_v20  ;;  %v3337_v37 = vld [vmem:[#allocation6 + $0x324] ss:$16 sps:$4 sm:$0xff]   ;;  %v3340_v42 = vld [vmem:[#allocation6 + $0x320] ss:$16 sps:$4 sm:$0xff]   ;;  %v111_v19 = vadd.f32 %v110_v8, %v79_v63  ;;  %v214_v8 = vunpack.c.l.bf16 %v205_v53 }
  0x4c   :  { %2118 = vmatprep.subr.bf16.mxu0 %v3313_v21  ;;  %v3341_v43 = vld [vmem:[#allocation6 + $0x144] ss:$16 sps:$4 sm:$0xff]   ;;  %v3345_v45 = vld [vmem:[#allocation6 + $0x140] ss:$16 sps:$4 sm:$0xff]  }
  0x4d   :  { %v3343_v44 = vld [vmem:[#allocation6 + $0x344] ss:$16 sps:$4 sm:$0xff]   ;;  %v3346_v46 = vld [vmem:[#allocation6 + $0x340] ss:$16 sps:$4 sm:$0xff]  }
  0x4e   :  { %2078 = vmatpush1.bf16.msra.mxu1 %v3315_v22  ;;  %v3347_v49 = vld [vmem:[#allocation6 + $0x164] ss:$16 sps:$4 sm:$0xff]   ;;  %v3351_v51 = vld [vmem:[#allocation6 + $0x160] ss:$16 sps:$4 sm:$0xff]  }
  0x4f   :  { %2119 = vmatpush1.bf16.msra.mxu0 %v3316_v23  ;;  %2079 = vmatprep.subr.bf16.mxu1 %v3317_v24  ;;  %v3349_v50 = vld [vmem:[#allocation6 + $0x364] ss:$16 sps:$4 sm:$0xff]   ;;  %v3352_v59 = vld [vmem:[#allocation6 + $0x360] ss:$16 sps:$4 sm:$0xff]  }
  0x50   :  { %2120 = vmatprep.subr.bf16.mxu0 %v3319_v25  ;;  %v68_v52 = vld [vmem:[#allocation3] sm:$0xff] }
  0x51   :  { %v72_v54 = vld [vmem:[#allocation3 + $0x40] sm:$0xff]  ;;  %v76_v56 = vunpack.c.l.bf16 %v68_v52  ;;  %v77_v57 = vunpack.c.h.bf16 %v68_v52 }
  0x52   :  { %2080 = vmatpush1.bf16.msra.mxu1 %v3321_v26  ;;  %v3353_v60 = vld [vmem:[#allocation6 + $0x184] ss:$16 sps:$4 sm:$0xff]   ;;  %v84_v0 = vunpack.c.l.bf16 %v72_v54  ;;  %v85_v1 = vunpack.c.h.bf16 %v72_v54  ;;  %v3357_v11 = vld [vmem:[#allocation6 + $0x180] ss:$16 sps:$4 sm:$0xff]   ;;  %v153_v26 = vadd.f32 %v152_v14, %v86_v2 }
  0x53   :  { %2121 = vmatpush1.bf16.msra.mxu0 %v3322_v27  ;;  %2081 = vmatprep.subr.bf16.mxu1 %v3323_v28  ;;  %v3355_v61 = vld [vmem:[#allocation6 + $0x384] ss:$16 sps:$4 sm:$0xff]   ;;  %v92_v4 = vrot.slane %v76_v56, 4  ;;  %v98_v5 = vrot.slane %v77_v57, 4  ;;  %v3358_v16 = vld [vmem:[#allocation6 + $0x380] ss:$16 sps:$4 sm:$0xff]  }
  0x54   :  { %2122 = vmatprep.subr.bf16.mxu0 %v3325_v29  ;;  %v3937_v6 = vld [vmem:[#allocation3 + $0x20] sm:$0xff]  ;;  %v140_v9 = vrot.slane %v84_v0, 4  ;;  %v146_v10 = vrot.slane %v85_v1, 4  ;;  %v106_v27 = vrot.slane %v105_v18, 2  ;;  %v112_v28 = vrot.slane %v111_v19, 2 }
  0x55   :  { %v93_v12 = vadd.f32 %v92_v4, %v76_v56  ;;  %v99_v13 = vadd.f32 %v98_v5, %v77_v57  ;;  %v3359_v17 = vld [vmem:[#allocation6 + $0x1a4] ss:$16 sps:$4 sm:$0xff]   ;;  %v212_v21 = vunpack.c.l.bf16 %v3937_v6  ;;  %v3369_v47 = vld [vmem:[#allocation6 + $0x1c0] ss:$16 sps:$4 sm:$0xff]   ;;  %v213_v7 = vunpack.c.h.bf16 %v3937_v6 }
  0x56   :  { %2082 = vmatpush1.bf16.msra.mxu1 %v3327_v30  ;;  %v141_v20 = vadd.f32 %v140_v9, %v84_v0  ;;  %v3361_v22 = vld [vmem:[#allocation6 + $0x3a4] ss:$16 sps:$4 sm:$0xff]   ;;  %v147_v25 = vadd.f32 %v146_v10, %v85_v1  ;;  %v159_v30 = vadd.f32 %v158_v15, %v87_v3  ;;  %v113_v39 = vadd.f32 %v112_v28, %v111_v19  ;;  %v209_v1 = vld [vmem:[#allocation3 + $0x68] sm:$0xff]  ;;  %v3375_v9 = vld [vmem:[#allocation6 + $0x1e0] ss:$16 sps:$4 sm:$0xff]  }
  0x57   :  { %2123 = vmatpush1.bf16.msra.mxu0 %v3328_v31  ;;  %2083 = vmatprep.subr.bf16.mxu1 %v3329_v32  ;;  %v94_v23 = vrot.slane %v93_v12, 2  ;;  %v100_v24 = vrot.slane %v99_v13, 2  ;;  %v3363_v31 = vld [vmem:[#allocation6 + $0x1a0] ss:$16 sps:$4 sm:$0xff]   ;;  %v3371_v2 = vld [vmem:[#allocation6 + $0x1e4] ss:$16 sps:$4 sm:$0xff]   ;;  %v222_v15 = vunpack.c.l.bf16 %v209_v1 }
  0x58   :  { %2124 = vmatprep.subr.bf16.mxu0 %v3331_v33  ;;  %v142_v29 = vrot.slane %v141_v20, 2  ;;  %v3364_v32 = vld [vmem:[#allocation6 + $0x3a0] ss:$16 sps:$4 sm:$0xff]   ;;  %v160_v41 = vrot.slane %v159_v30, 2  ;;  %v3373_v3 = vld [vmem:[#allocation6 + $0x3e4] ss:$16 sps:$4 sm:$0xff]  }
  0x59   :  { %v95_v33 = vadd.f32 %v94_v23, %v93_v12  ;;  %v3376_v14 = vld [vmem:[#allocation6 + $0x3e0] ss:$16 sps:$4 sm:$0xff]   ;;  %v240_v19 = vrot.slane %v214_v8, 4 }
  0x5a   :  { %2084 = vmatpush1.bf16.msra.mxu1 %v3333_v34  ;;  %v101_v34 = vadd.f32 %v100_v24, %v99_v13  ;;  %v143_v40 = vadd.f32 %v142_v29, %v141_v20  ;;  %v161_v52 = vadd.f32 %v160_v41, %v159_v30  ;;  %v3379_v24 = vld [vmem:[#allocation6 + $0x404] ss:$16 sps:$4 sm:$0xff]   ;;  %v3382_v29 = vld [vmem:[#allocation6 + $0xc] ss:$16 sps:$4 sm:$0xff]  }
  0x5b   :  { %2125 = vmatpush1.bf16.msra.mxu0 %v3334_v35  ;;  %2085 = vmatprep.subr.bf16.mxu1 %v3335_v36  ;;  %v148_v35 = vrot.slane %v147_v25, 2  ;;  %v154_v36 = vrot.slane %v153_v26, 2  ;;  %v241_v30 = vadd.f32 %v240_v19, %v214_v8 }
  0x5c   :  { %2126 = vmatprep.subr.bf16.mxu0 %v3337_v37  ;;  %v3365_v37 = vld [vmem:[#allocation6 + $0x1c4] ss:$16 sps:$4 sm:$0xff]   ;;  %v162_v0 = vrot.slane %v161_v52, 1 }
  0x5e   :  { %2086 = vmatpush1.bf16.msra.mxu1 %v3339_v38  ;;  %v107_v38 = vadd.f32 %v106_v27, %v105_v18  ;;  %v3955_v10 = vadd.f32 %v162_v0, %v161_v52  ;;  %v234_v18 = vrot.slane %v213_v7, 4  ;;  %v288_v27 = vrot.slane %v222_v15, 4 }
  0x5f   :  { %2127 = vmatpush1.bf16.msra.mxu0 %v3340_v42  ;;  %2087 = vmatprep.subr.bf16.mxu1 %v3341_v43  ;;  %v3367_v42 = vld [vmem:[#allocation6 + $0x3c4] ss:$16 sps:$4 sm:$0xff]   ;;  %v96_v43 = vrot.slane %v95_v33, 1 }
  0x60   :  { %2128 = vmatprep.subr.bf16.mxu0 %v3343_v44  ;;  %v102_v44 = vrot.slane %v101_v34, 1 }
  0x61   :  { %v3940_v54 = vadd.f32 %v96_v43, %v95_v33 }
  0x62   :  { %2088 = vmatpush1.bf16.msra.mxu1 %v3345_v45  ;;  %v149_v45 = vadd.f32 %v148_v35, %v147_v25  ;;  %v3942_v55 = vadd.f32 %v102_v44, %v101_v34 }
  0x63   :  { %2129 = vmatpush1.bf16.msra.mxu0 %v3346_v46  ;;  %2089 = vmatprep.subr.bf16.mxu1 %v3347_v49  ;;  %v155_v46 = vadd.f32 %v154_v36, %v153_v26  ;;  %v108_v49 = vrot.slane %v107_v38, 1  ;;  %v235_v26 = vadd.f32 %v234_v18, %v213_v7  ;;  %v289_v36 = vadd.f32 %v288_v27, %v222_v15 }
  0x64   :  { %2130 = vmatprep.subr.bf16.mxu0 %v3349_v50  ;;  %v114_v50 = vrot.slane %v113_v39, 1  ;;  %v150_v56 = vrot.slane %v149_v45, 1 }
  0x65   :  { %v156_v57 = vrot.slane %v155_v46, 1  ;;  %v236_v35 = vrot.slane %v235_v26, 2 }
  0x66   :  { %2090 = vmatpush1.bf16.msra.mxu1 %v3351_v51  ;;  %v144_v51 = vrot.slane %v143_v40, 1  ;;  %v3946_v62 = vadd.f32 %v114_v50, %v113_v39  ;;  %v3950_v4 = vadd.f32 %v150_v56, %v149_v45 }
  0x67   :  { %2131 = vmatpush1.bf16.msra.mxu0 %v3352_v59  ;;  %2091 = vmatprep.subr.bf16.mxu1 %v3353_v60  ;;  %v208_v59 = vld [vmem:[#allocation3 + $0x60] sm:$0xff]  ;;  %v3952_v5 = vadd.f32 %v156_v57, %v155_v46 }
  0x68   :  { %2132 = vmatprep.subr.bf16.mxu0 %v3355_v61  ;;  %v3370_v60 = vld [vmem:[#allocation6 + $0x3c0] ss:$16 sps:$4 sm:$0xff]   ;;  %v3944_v61 = vadd.f32 %v108_v49, %v107_v38  ;;  %v3948_v63 = vadd.f32 %v144_v51, %v143_v40  ;;  %v220_v12 = vunpack.c.l.bf16 %v208_v59  ;;  %v221_v13 = vunpack.c.h.bf16 %v208_v59 }
  0x69   :  { %v242_v38 = vrot.slane %v241_v30, 2 }
  0x6a   :  { %2092 = vmatpush1.bf16.msra.mxu1 %v3357_v11  ;;  %v215_v11 = vunpack.c.h.bf16 %v205_v53  ;;  %v282_v23 = vrot.slane %v221_v13, 4 }
  0x6b   :  { %2133 = vmatpush1.bf16.msra.mxu0 %v3358_v16  ;;  %2093 = vmatprep.subr.bf16.mxu1 %v3359_v17  ;;  %v223_v16 = vunpack.c.h.bf16 %v209_v1  ;;  %v228_v17 = vrot.slane %v212_v21, 4  ;;  %v243_v44 = vadd.f32 %v242_v38, %v241_v30 }
  0x6c   :  { %2134 = vmatprep.subr.bf16.mxu0 %v3361_v22  ;;  %v246_v20 = vrot.slane %v215_v11, 4  ;;  %v276_v22 = vrot.slane %v220_v12, 4  ;;  %v283_v33 = vadd.f32 %v282_v23, %v221_v13 }
  0x6d   :  { %v229_v25 = vadd.f32 %v228_v17, %v212_v21  ;;  %v294_v28 = vrot.slane %v223_v16, 4  ;;  %v237_v21 = vadd.f32 %v236_v35, %v235_v26  ;;  %v244_v53 = vrot.slane %v243_v44, 1 }
  0x6e   :  { %2094 = vmatpush1.bf16.msra.mxu1 %v3363_v31  ;;  %v247_v31 = vadd.f32 %v246_v20, %v215_v11  ;;  %v284_v41 = vrot.slane %v283_v33, 2 }
  0x6f   :  { %2135 = vmatpush1.bf16.msra.mxu0 %v3364_v32  ;;  %2095 = vmatprep.subr.bf16.mxu1 %v3365_v37  ;;  %v277_v32 = vadd.f32 %v276_v22, %v220_v12  ;;  %v230_v34 = vrot.slane %v229_v25, 2  ;;  %v295_v37 = vadd.f32 %v294_v28, %v223_v16  ;;  %v238_v50 = vrot.slane %v237_v21, 1 }
  0x70   :  { %2136 = vmatprep.subr.bf16.mxu0 %v3367_v42  ;;  %v248_v39 = vrot.slane %v247_v31, 2  ;;  %v290_v42 = vrot.slane %v289_v36, 2 }
  0x71   :  { %v278_v40 = vrot.slane %v277_v32, 2  ;;  %v231_v6 = vadd.f32 %v230_v34, %v229_v25  ;;  %v296_v43 = vrot.slane %v295_v37, 2  ;;  %v239_v0 = vadd.f32 %v238_v50, %v237_v21  ;;  %v3377_v21 = vld [vmem:[#allocation6 + $0x400] ss:$16 sps:$4 sm:$0xff]  }
  0x72   :  { %2096 = vmatpush1.bf16.msra.mxu1 %v3369_v47  ;;  %v249_v45 = vadd.f32 %v248_v39, %v247_v31  ;;  %v285_v47 = vadd.f32 %v284_v41, %v283_v33  ;;  %v291_v51 = vadd.f32 %v290_v42, %v289_v36  ;;  %v3380_v36 = vld [vmem:[#allocation6 + $0x8] ss:$16 sps:$4 sm:$0xff]   ;;  %v70_v39 = vld [vmem:[#allocation3 + $0x10] sm:$0xff] }
  0x73   :  { %2137 = vmatpush1.bf16.msra.mxu0 %v3370_v60  ;;  %2097 = vmatprep.subr.bf16.mxu1 %v3371_v2  ;;  %v279_v46 = vadd.f32 %v278_v40, %v277_v32  ;;  %v232_v49 = vrot.slane %v231_v6, 1  ;;  %v297_v52 = vadd.f32 %v296_v43, %v295_v37  ;;  %v3388_v37 = vld [vmem:[#allocation6 + $0x2c] ss:$16 sps:$4 sm:$0xff]   ;;  %v74_v41 = vld [vmem:[#allocation3 + $0x50] sm:$0xff]  ;;  %v80_v43 = vunpack.c.l.bf16 %v70_v39 }
  0x74   :  { %2138 = vmatprep.subr.bf16.mxu0 %v3373_v3  ;;  %v250_v56 = vrot.slane %v249_v45, 1  ;;  %v286_v59 = vrot.slane %v285_v47, 1  ;;  %v292_v1 = vrot.slane %v291_v51, 1  ;;  %v245_v3 = vadd.f32 %v244_v53, %v243_v44  ;;  %v71_v40 = vld [vmem:[#allocation3 + $0x18] sm:$0xff] }
  0x75   :  { %v280_v57 = vrot.slane %v279_v46, 1  ;;  %v233_v60 = vadd.f32 %v232_v49, %v231_v6  ;;  %v298_v2 = vrot.slane %v297_v52, 1  ;;  %v75_v42 = vld [vmem:[#allocation3 + $0x58] sm:$0xff]  ;;  %v81_v44 = vunpack.c.h.bf16 %v70_v39 }
  0x76   :  { %2098 = vmatpush1.bf16.msra.mxu1 %v3375_v9  ;;  %v251_v7 = vadd.f32 %v250_v56, %v249_v45  ;;  %v287_v9 = vadd.f32 %v286_v59, %v285_v47  ;;  %v293_v11 = vadd.f32 %v292_v1, %v291_v51  ;;  %v326_v15 = vadd.f32 %v245_v3, %v3944_v61 }
  0x77   :  { %2139 = vmatpush1.bf16.msra.mxu0 %v3376_v14  ;;  %2231 = vmatprep.subr.bf16.mxu1 %v3382_v29  ;;  %v281_v8 = vadd.f32 %v280_v57, %v279_v46  ;;  %v299_v12 = vadd.f32 %v298_v2, %v297_v52  ;;  %v324_v13 = vadd.f32 %v233_v60, %v3940_v54  ;;  %v82_v45 = vunpack.c.l.bf16 %v71_v40  ;;  %v3385_v46 = vld [vmem:[#allocation6 + $0x424] ss:$16 sps:$4 sm:$0xff]   ;;  %v3386_v52 = vld [vmem:[#allocation6 + $0x28] ss:$16 sps:$4 sm:$0xff]   ;;  %v3394_v60 = vld [vmem:[#allocation6 + $0x4c] ss:$16 sps:$4 sm:$0xff]  }
  0x78   :  { %2149 = vmatprep.subr.bf16.mxu0 %v3379_v24  ;;  %v325_v14 = vadd.f32 %v239_v0, %v3942_v55  ;;  %v327_v16 = vadd.f32 %v251_v7, %v3946_v62  ;;  %v333_v18 = vadd.f32 %v287_v9, %v3950_v4  ;;  %v334_v19 = vadd.f32 %v293_v11, %v3952_v5  ;;  %v3383_v7 = vld [vmem:[#allocation6 + $0x420] ss:$16 sps:$4 sm:$0xff]  }
  0x79   :  { %v332_v17 = vadd.f32 %v281_v8, %v3948_v63  ;;  %v335_v20 = vadd.f32 %v299_v12, %v3955_v10  ;;  %v83_v47 = vunpack.c.h.bf16 %v71_v40  ;;  %v88_v49 = vunpack.c.l.bf16 %v74_v41  ;;  %v206_v40 = vld [vmem:[#allocation3 + $0x30] sm:$0xff] }
  0x7a   :  { %v358_v22 = vcombine.low %v324_v13, %v325_v14  ;;  %v359_v23 = vcombine.low %v326_v15, %v327_v16  ;;  %v89_v50 = vunpack.c.h.bf16 %v74_v41  ;;  %v90_v51 = vunpack.c.l.bf16 %v75_v42  ;;  %v3391_v13 = vld [vmem:[#allocation6 + $0x444] ss:$16 sps:$4 sm:$0xff]   ;;  %v207_v41 = vld [vmem:[#allocation3 + $0x38] sm:$0xff] }
  0x7b   :  { %v392_v24 = vcombine.low %v332_v17, %v333_v18  ;;  %v393_v54 = vcombine.low %v334_v19, %v335_v20  ;;  %v91_v53 = vunpack.c.h.bf16 %v75_v42  ;;  %v116_v56 = vrot.slane %v80_v43, 4  ;;  %v3389_v18 = vld [vmem:[#allocation6 + $0x440] ss:$16 sps:$4 sm:$0xff]   ;;  %v3392_v19 = vld [vmem:[#allocation6 + $0x48] ss:$16 sps:$4 sm:$0xff]  }
  0x7c   :  { %v366_v25 = vrot.slane %v358_v22, %v3935_v58  ;;  %v373_v55 = vrot.slane %v359_v23, %v3935_v58  ;;  %v122_v57 = vrot.slane %v81_v44, 4  ;;  %v128_v59 = vrot.slane %v82_v45, 4 }
  0x7d   :  { %v400_v61 = vrot.slane %v392_v24, %v3935_v58  ;;  %v407_v62 = vrot.slane %v393_v54, %v3935_v58  ;;  %v134_v0 = vrot.slane %v83_v47, 4  ;;  %v164_v1 = vrot.slane %v88_v49, 4 }
  0x7e   :  { %v374_v26 = vcombine.low %v366_v25, %v373_v55  ;;  %v170_v2 = vrot.slane %v89_v50, 4  ;;  %v176_v3 = vrot.slane %v90_v51, 4  ;;  %v117_v8 = vadd.f32 %v116_v56, %v80_v43  ;;  %v3400_v25 = vld [vmem:[#allocation6 + $0x6c] ss:$16 sps:$4 sm:$0xff]  }
  0x7f   :  { %v408_v63 = vcombine.low %v400_v61, %v407_v62  ;;  %v123_v9 = vadd.f32 %v122_v57, %v81_v44  ;;  %v129_v11 = vadd.f32 %v128_v59, %v82_v45  ;;  %v182_v12 = vrot.slane %v91_v53, 4 }
  0x80   :  { %v135_v14 = vadd.f32 %v134_v0, %v83_v47  ;;  %v165_v15 = vadd.f32 %v164_v1, %v88_v49  ;;  %v171_v16 = vadd.f32 %v170_v2, %v89_v50  ;;  %v177_v17 = vadd.f32 %v176_v3, %v90_v51  ;;  %v210_v50 = vld [vmem:[#allocation3 + $0x70] sm:$0xff]  ;;  %v211_v51 = vld [vmem:[#allocation3 + $0x78] sm:$0xff] }
  0x81   :  { %v430_v4 = vrot.slane %v408_v63, 7  ;;  %v118_v20 = vrot.slane %v117_v8, 2  ;;  %v124_v22 = vrot.slane %v123_v9, 2  ;;  %v130_v23 = vrot.slane %v129_v11, 2  ;;  %v3398_v63 = vld [vmem:[#allocation6 + $0x68] ss:$16 sps:$4 sm:$0xff]  }
  0x82   :  { %v183_v24 = vadd.f32 %v182_v12, %v91_v53  ;;  %v136_v54 = vrot.slane %v135_v14, 2  ;;  %v166_v55 = vrot.slane %v165_v15, 2  ;;  %v172_v61 = vrot.slane %v171_v16, 2  ;;  %v3404_v0 = vld [vmem:[#allocation6 + $0x88] ss:$16 sps:$4 sm:$0xff]  }
  0x83   :  { %v432_v5 = vsel %vm431_vm0, %v430_v4, %v374_v26  ;;  %v178_v62 = vrot.slane %v177_v17, 2  ;;  %v3397_v26 = vld [vmem:[#allocation6 + $0x464] ss:$16 sps:$4 sm:$0xff]   ;;  %v216_v2 = vunpack.c.l.bf16 %v206_v40  ;;  %v217_v3 = vunpack.c.h.bf16 %v206_v40 }
  0x84   :  { %v434_v10 = vsel %vm433_vm1, %v430_v4, %v432_v5  ;;  %v125_v5 = vadd.f32 %v124_v22, %v123_v9  ;;  %v219_v9 = vunpack.c.h.bf16 %v207_v41  ;;  %v225_v12 = vunpack.c.h.bf16 %v210_v50 }
  0x85   :  { %v436_v27 = vsel %vm435_vm2, %v430_v4, %v434_v10  ;;  %v131_v10 = vadd.f32 %v130_v23, %v129_v11  ;;  %v224_v11 = vunpack.c.l.bf16 %v210_v50 }
  0x86   :  { %v438_v28 = vsel %vm437_vm3, %v430_v4, %v436_v27  ;;  %v119_v4 = vadd.f32 %v118_v20, %v117_v8  ;;  %v184_v27 = vrot.slane %v183_v24, 2  ;;  %v3412_v8 = vld [vmem:[#allocation6 + $0xac] ss:$16 sps:$4 sm:$0xff]   ;;  %v306_v22 = vrot.slane %v225_v12, 4 }
  0x87   :  { %v466_v29 = vrot.slane %v438_v28, %v3935_v58  ;;  %v459_v30 = vcombine.high %v438_v28, %v438_v28  ;;  %v3406_v28 = vld [vmem:[#allocation6 + $0x8c] ss:$16 sps:$4 sm:$0xff]   ;;  %v300_v20 = vrot.slane %v224_v11, 4 }
  0x88   :  { %v185_v39 = vadd.f32 %v184_v27, %v183_v24  ;;  %v3410_v24 = vld [vmem:[#allocation6 + $0xa8] ss:$16 sps:$4 sm:$0xff]  }
  0x89   :  { %v474_v31 = vcombine.high %v466_v29, %v466_v29  ;;  %v473_v32 = vrot.slane %v459_v30, %v3935_v58  ;;  %v3979_v33 = vpack.c.bf16 %v466_v29, %v466_v29  ;;  %v137_v29 = vadd.f32 %v136_v54, %v135_v14  ;;  %v3409_v14 = vld [vmem:[#allocation6 + $0x4a4] ss:$16 sps:$4 sm:$0xff]  }
  0x8a   :  { %v167_v30 = vadd.f32 %v166_v55, %v165_v15  ;;  %v186_v49 = vrot.slane %v185_v39, 1  ;;  %v227_v15 = vunpack.c.h.bf16 %v211_v51 }
  0x8b   :  { %v502_v34 = vpack.c.bf16 %v474_v31, %v474_v31  ;;  %v475_v35 = vcombine.high %v473_v32, %v473_v32  ;;  %v3981_v38 = vpack.c.bf16 %v473_v32, %v473_v32  ;;  %v173_v31 = vadd.f32 %v172_v61, %v171_v16 }
  0x8c   :  { %v179_v32 = vadd.f32 %v178_v62, %v177_v17  ;;  %v168_v42 = vrot.slane %v167_v30, 1  ;;  %v4002_v1 = vadd.f32 %v186_v49, %v185_v39  ;;  %v252_v16 = vrot.slane %v216_v2, 4  ;;  %v3418_v62 = vld [vmem:[#allocation6 + $0xcc] ss:$16 sps:$4 sm:$0xff]  }
  0x8d   :  { %2099 = vmatprep.mubr.bf16.mxu1 %v502_v34  ;;  %v3983_v6 = vpack.c.bf16 %v475_v35, %v475_v35  ;;  %v120_v35 = vrot.slane %v119_v4, 1  ;;  %v174_v43 = vrot.slane %v173_v31, 1  ;;  %v258_v17 = vrot.slane %v217_v3, 4 }
  0x8e   :  { %2100 = vmatmul.mubr.bf16.vlgmr.msra.gmra.mrb[0].mxu1 %v3979_v33  ;;  %v180_v44 = vrot.slane %v179_v32, 1  ;;  %v3996_v56 = vadd.f32 %v168_v42, %v167_v30  ;;  %v318_v61 = vrot.slane %v227_v15, 4  ;;  %v3424_v42 = vld [vmem:[#allocation6 + $0xec] ss:$16 sps:$4 sm:$0xff]  }
  0x8f   :  { %2140 = vmatprep.mubr.bf16.mxu0 %v3983_v6  ;;  %2232 = vmatpush1.bf16.msra.mxu1 %v3380_v36  ;;  %v126_v36 = vrot.slane %v125_v5, 1  ;;  %v3988_v45 = vadd.f32 %v120_v35, %v119_v4  ;;  %v3998_v57 = vadd.f32 %v174_v43, %v173_v31  ;;  %v259_v54 = vadd.f32 %v258_v17, %v217_v3  ;;  %v3415_v31 = vld [vmem:[#allocation6 + $0x4c4] ss:$16 sps:$4 sm:$0xff]   ;;  %v3430_v17 = vld [vmem:[#allocation6 + $0x10c] ss:$16 sps:$4 sm:$0xff]  }
  0x90   :  { %2141 = vmatmul.mubr.bf16.vlgmr.msra.gmra.mrb[0].mxu0 %v3981_v38  ;;  %2233 = vmatprep.subr.bf16.mxu1 %v3388_v37  ;;  %v132_v37 = vrot.slane %v131_v10, 1  ;;  %v4000_v59 = vadd.f32 %v180_v44, %v179_v32  ;;  %v307_v4 = vadd.f32 %v306_v22, %v225_v12  ;;  %v319_v30 = vadd.f32 %v318_v61, %v227_v15  ;;  %v3421_v3 = vld [vmem:[#allocation6 + $0x4e4] ss:$16 sps:$4 sm:$0xff]   ;;  %v3422_v12 = vld [vmem:[#allocation6 + $0xe8] ss:$16 sps:$4 sm:$0xff]  }
  0x91   :  { %2150 = vmatpush1.bf16.msra.mxu0 %v3377_v21  ;;  %2263 = vmatprep.mubr.bf16.mxu1 %v502_v34  ;;  %v3395_v34 = vld [vmem:[#allocation6 + $0x460] ss:$16 sps:$4 sm:$0xff]   ;;  %v138_v21 = vrot.slane %v137_v29, 1  ;;  %v3427_v61 = vld [vmem:[#allocation6 + $0x504] ss:$16 sps:$4 sm:$0xff]  }
  0x92   :  { %2151 = vmatprep.subr.bf16.mxu0 %v3385_v46  ;;  %v3990_v46 = vadd.f32 %v126_v36, %v125_v5  ;;  %v3992_v47 = vadd.f32 %v132_v37, %v131_v10  ;;  %v3407_v10 = vld [vmem:[#allocation6 + $0x4a0] ss:$16 sps:$4 sm:$0xff]   ;;  %v308_v35 = vrot.slane %v307_v4, 2  ;;  %v3416_v37 = vld [vmem:[#allocation6 + $0xc8] ss:$16 sps:$4 sm:$0xff]  }
  0x93   :  { %2234 = vmatpush1.bf16.msra.mxu1 %v3386_v52  ;;  %v3403_v52 = vld [vmem:[#allocation6 + $0x484] ss:$16 sps:$4 sm:$0xff]   ;;  %v3994_v53 = vadd.f32 %v138_v21, %v137_v29  ;;  %v320_v21 = vrot.slane %v319_v30, 2 }
  0x94   :  { %2235 = vmatprep.subr.bf16.mxu1 %v3394_v60  ;;  %v3401_v60 = vld [vmem:[#allocation6 + $0x480] ss:$16 sps:$4 sm:$0xff]   ;;  %v309_v49 = vadd.f32 %v308_v35, %v307_v4 }
  0x95   :  { %2152 = vmatpush1.bf16.msra.mxu0 %v3383_v7  ;;  %v218_v7 = vunpack.c.l.bf16 %v207_v41 }
  0x96   :  { %2153 = vmatprep.subr.bf16.mxu0 %v3391_v13  ;;  %v226_v13 = vunpack.c.l.bf16 %v211_v51  ;;  %v3413_v51 = vld [vmem:[#allocation6 + $0x4c0] ss:$16 sps:$4 sm:$0xff]  }
  0x97   :  { %2236 = vmatpush1.bf16.msra.mxu1 %v3392_v19  ;;  %v270_v19 = vrot.slane %v219_v9, 4 }
  0x98   :  { %2237 = vmatprep.subr.bf16.mxu1 %v3400_v25  ;;  %v312_v23 = vrot.slane %v226_v13, 4  ;;  %v253_v25 = vadd.f32 %v252_v16, %v216_v2  ;;  %v321_v2 = vadd.f32 %v320_v21, %v319_v30  ;;  %v3434_v30 = vld [vmem:[#allocation6 + $0x128] ss:$16 sps:$4 sm:$0xff]  }
  0x99   :  { %2154 = vmatpush1.bf16.msra.mxu0 %v3389_v18  ;;  %v264_v18 = vrot.slane %v218_v7, 4 }
  0x9a   :  { %2155 = vmatprep.subr.bf16.mxu0 %v3397_v26  ;;  %v271_v26 = vadd.f32 %v270_v19, %v219_v9  ;;  %v313_v5 = vadd.f32 %v312_v23, %v226_v13  ;;  %v254_v27 = vrot.slane %v253_v25, 2  ;;  %v310_v9 = vrot.slane %v309_v49, 1  ;;  %v3419_v23 = vld [vmem:[#allocation6 + $0x4e0] ss:$16 sps:$4 sm:$0xff]  }
  0x9b   :  { %2238 = vmatpush1.bf16.msra.mxu1 %v3398_v63  ;;  %v265_v55 = vadd.f32 %v264_v18, %v218_v7  ;;  %v301_v63 = vadd.f32 %v300_v20, %v224_v11  ;;  %v322_v16 = vrot.slane %v321_v2, 1 }
  0x9c   :  { %2239 = vmatprep.subr.bf16.mxu1 %v3406_v28  ;;  %v260_v28 = vrot.slane %v259_v54, 2  ;;  %v272_v32 = vrot.slane %v271_v26, 2  ;;  %v314_v36 = vrot.slane %v313_v5, 2  ;;  %v255_v39 = vadd.f32 %v254_v27, %v253_v25 }
  0x9d   :  { %2156 = vmatpush1.bf16.msra.mxu0 %v3395_v34  ;;  %v266_v29 = vrot.slane %v265_v55, 2  ;;  %v302_v34 = vrot.slane %v301_v63, 2  ;;  %v311_v20 = vadd.f32 %v310_v9, %v309_v49 }
  0x9e   :  { %2157 = vmatprep.subr.bf16.mxu0 %v3403_v52  ;;  %v261_v40 = vadd.f32 %v260_v28, %v259_v54  ;;  %v273_v43 = vadd.f32 %v272_v32, %v271_v26  ;;  %v315_v50 = vadd.f32 %v314_v36, %v313_v5  ;;  %v256_v52 = vrot.slane %v255_v39, 1  ;;  %v3428_v5 = vld [vmem:[#allocation6 + $0x108] ss:$16 sps:$4 sm:$0xff]   ;;  %v3431_v32 = vld [vmem:[#allocation6 + $0x520] ss:$16 sps:$4 sm:$0xff]  }
  0x9f   :  { %2240 = vmatpush1.bf16.msra.mxu1 %v3404_v0  ;;  %v267_v41 = vadd.f32 %v266_v29, %v265_v55  ;;  %v303_v44 = vadd.f32 %v302_v34, %v301_v63  ;;  %v337_v63 = vadd.f32 %v311_v20, %v3998_v57  ;;  %v3439_v36 = vld [vmem:[#allocation6 + $0x544] ss:$16 sps:$4 sm:$0xff]  }
  0xa0   :  { %2241 = vmatprep.subr.bf16.mxu1 %v3412_v8  ;;  %v274_v7 = vrot.slane %v273_v43, 1  ;;  %v316_v11 = vrot.slane %v315_v50, 1  ;;  %v257_v13 = vadd.f32 %v256_v52, %v255_v39  ;;  %v3443_v52 = vld [vmem:[#allocation6 + $0x560] ss:$16 sps:$4 sm:$0xff]  }
  0xa1   :  { %2158 = vmatpush1.bf16.msra.mxu0 %v3401_v60  ;;  %v262_v60 = vrot.slane %v261_v40, 1  ;;  %v268_v0 = vrot.slane %v267_v41, 1  ;;  %v304_v8 = vrot.slane %v303_v44, 1 }
  0xa2   :  { %2159 = vmatprep.subr.bf16.mxu0 %v3409_v14  ;;  %v275_v18 = vadd.f32 %v274_v7, %v273_v43  ;;  %v317_v22 = vadd.f32 %v316_v11, %v315_v50  ;;  %v328_v25 = vadd.f32 %v257_v13, %v3988_v45  ;;  %v3436_v45 = vld [vmem:[#allocation6 + $0x12c] ss:$16 sps:$4 sm:$0xff]   ;;  %v3457_v11 = vld [vmem:[#allocation6 + $0x5a4] ss:$16 sps:$4 sm:$0xff]  }
  0xa3   :  { %2242 = vmatpush1.bf16.msra.mxu1 %v3410_v24  ;;  %v263_v14 = vadd.f32 %v262_v60, %v261_v40  ;;  %v269_v15 = vadd.f32 %v268_v0, %v267_v41  ;;  %v305_v19 = vadd.f32 %v304_v8, %v303_v44  ;;  %v323_v24 = vadd.f32 %v322_v16, %v321_v2  ;;  %v3448_v40 = vld [vmem:[#allocation6 + $0x16c] ss:$16 sps:$4 sm:$0xff]   ;;  %v3437_v41 = vld [vmem:[#allocation6 + $0x540] ss:$16 sps:$4 sm:$0xff]   ;;  %v3446_v44 = vld [vmem:[#allocation6 + $0x168] ss:$16 sps:$4 sm:$0xff]  }
  0xa4   :  { %2243 = vmatprep.subr.bf16.mxu1 %v3418_v62  ;;  %v331_v62 = vadd.f32 %v275_v18, %v3994_v53  ;;  %v338_v4 = vadd.f32 %v317_v22, %v4000_v59  ;;  %v3454_v50 = vld [vmem:[#allocation6 + $0x18c] ss:$16 sps:$4 sm:$0xff]   ;;  %v3451_v0 = vld [vmem:[#allocation6 + $0x584] ss:$16 sps:$4 sm:$0xff]   ;;  %v3452_v2 = vld [vmem:[#allocation6 + $0x188] ss:$16 sps:$4 sm:$0xff]  }
  0xa5   :  { %2160 = vmatpush1.bf16.msra.mxu0 %v3407_v10  ;;  %v329_v54 = vadd.f32 %v263_v14, %v3990_v46  ;;  %v330_v55 = vadd.f32 %v269_v15, %v3992_v47  ;;  %v336_v26 = vadd.f32 %v305_v19, %v3996_v56  ;;  %v339_v10 = vadd.f32 %v323_v24, %v4002_v1  ;;  %v3425_v47 = vld [vmem:[#allocation6 + $0x500] ss:$16 sps:$4 sm:$0xff]   ;;  %v3433_v56 = vld [vmem:[#allocation6 + $0x524] ss:$16 sps:$4 sm:$0xff]   ;;  %v3460_v7 = vld [vmem:[#allocation6 + $0x1ac] ss:$16 sps:$4 sm:$0xff]  }
  0xa6   :  { %2161 = vmatprep.subr.bf16.mxu0 %v3415_v31  ;;  %v3442_v31 = vld [vmem:[#allocation6 + $0x14c] ss:$16 sps:$4 sm:$0xff]   ;;  %v3449_v8 = vld [vmem:[#allocation6 + $0x580] ss:$16 sps:$4 sm:$0xff]   ;;  %v3463_v16 = vld [vmem:[#allocation6 + $0x5c4] ss:$16 sps:$4 sm:$0xff]  }
  0xa7   :  { %2244 = vmatpush1.bf16.msra.mxu1 %v3416_v37  ;;  %v375_v27 = vcombine.low %v328_v25, %v329_v54  ;;  %v376_v46 = vcombine.low %v330_v55, %v331_v62  ;;  %v409_v28 = vcombine.low %v336_v26, %v337_v63  ;;  %v410_v53 = vcombine.low %v338_v4, %v339_v10  ;;  %v3440_v37 = vld [vmem:[#allocation6 + $0x148] ss:$16 sps:$4 sm:$0xff]   ;;  %v3466_v13 = vld [vmem:[#allocation6 + $0x1cc] ss:$16 sps:$4 sm:$0xff]   ;;  %v3455_v14 = vld [vmem:[#allocation6 + $0x5a0] ss:$16 sps:$4 sm:$0xff]  }
  0xa8   :  { %2245 = vmatprep.subr.bf16.mxu1 %v3424_v42  ;;  %v3445_v42 = vld [vmem:[#allocation6 + $0x564] ss:$16 sps:$4 sm:$0xff]   ;;  %v3472_v18 = vld [vmem:[#allocation6 + $0x1ec] ss:$16 sps:$4 sm:$0xff]   ;;  %v3461_v19 = vld [vmem:[#allocation6 + $0x5c0] ss:$16 sps:$4 sm:$0xff]  }
  0xa9   :  { %2162 = vmatpush1.bf16.msra.mxu0 %v3413_v51  ;;  %v383_v29 = vrot.slane %v375_v27, %v3935_v58  ;;  %v390_v57 = vrot.slane %v376_v46, %v3935_v58  ;;  %v417_v59 = vrot.slane %v409_v28, %v3935_v58  ;;  %v424_v1 = vrot.slane %v410_v53, %v3935_v58  ;;  %v3469_v22 = vld [vmem:[#allocation6 + $0x5e4] ss:$16 sps:$4 sm:$0xff]   ;;  %v3478_v24 = vld [vmem:[#allocation6 + $0x20c] ss:$16 sps:$4 sm:$0xff]   ;;  %v3467_v25 = vld [vmem:[#allocation6 + $0x5e0] ss:$16 sps:$4 sm:$0xff]  }
  0xaa   :  { %2163 = vmatprep.subr.bf16.mxu0 %v3421_v3  ;;  %v3475_v55 = vld [vmem:[#allocation6 + $0x604] ss:$16 sps:$4 sm:$0xff]   ;;  %v3473_v26 = vld [vmem:[#allocation6 + $0x600] ss:$16 sps:$4 sm:$0xff]   ;;  %v3490_v10 = vld [vmem:[#allocation6 + $0x24c] ss:$16 sps:$4 sm:$0xff]  }
  0xab   :  { %2246 = vmatpush1.bf16.msra.mxu1 %v3422_v12  ;;  %v391_v34 = vcombine.low %v383_v29, %v390_v57  ;;  %v425_v35 = vcombine.low %v417_v59, %v424_v1  ;;  %v3458_v12 = vld [vmem:[#allocation6 + $0x1a8] ss:$16 sps:$4 sm:$0xff]   ;;  %v3481_v4 = vld [vmem:[#allocation6 + $0x624] ss:$16 sps:$4 sm:$0xff]   ;;  %v3479_v27 = vld [vmem:[#allocation6 + $0x620] ss:$16 sps:$4 sm:$0xff]  }
  0xac   :  { %2247 = vmatprep.subr.bf16.mxu1 %v3430_v17  ;;  %v3464_v17 = vld [vmem:[#allocation6 + $0x1c8] ss:$16 sps:$4 sm:$0xff]   ;;  %v3496_v28 = vld [vmem:[#allocation6 + $0x26c] ss:$16 sps:$4 sm:$0xff]   ;;  %v3497_v57 = vld [vmem:[#allocation6 + $0x680] ss:$16 sps:$4 sm:$0xff]  }
  0xad   :  { %2164 = vmatpush1.bf16.msra.mxu0 %v3419_v23  ;;  %v441_v39 = vrot.slane %v425_v35, 7  ;;  %v3470_v23 = vld [vmem:[#allocation6 + $0x1e8] ss:$16 sps:$4 sm:$0xff]   ;;  %v3502_v53 = vld [vmem:[#allocation6 + $0x28c] ss:$16 sps:$4 sm:$0xff]  }
  0xae   :  { %2165 = vmatprep.subr.bf16.mxu0 %v3427_v61  ;;  %v3476_v61 = vld [vmem:[#allocation6 + $0x208] ss:$16 sps:$4 sm:$0xff]   ;;  %v3505_v1 = vld [vmem:[#allocation6 + $0x6a4] ss:$16 sps:$4 sm:$0xff]  }
  0xaf   :  { %2248 = vmatpush1.bf16.msra.mxu1 %v3428_v5  ;;  %v442_v21 = vsel %vm431_vm0, %v441_v39, %v391_v34  ;;  %v3482_v5 = vld [vmem:[#allocation6 + $0x228] ss:$16 sps:$4 sm:$0xff]   ;;  %v3514_v34 = vld [vmem:[#allocation6 + $0x2cc] ss:$16 sps:$4 sm:$0xff]   ;;  %v3511_v35 = vld [vmem:[#allocation6 + $0x6c4] ss:$16 sps:$4 sm:$0xff]  }
  0xb0   :  { %2249 = vmatprep.subr.bf16.mxu1 %v3436_v45  ;;  %v443_v43 = vsel %vm433_vm1, %v441_v39, %v442_v21  ;;  %v3487_v45 = vld [vmem:[#allocation6 + $0x644] ss:$16 sps:$4 sm:$0xff]   ;;  %v3488_v46 = vld [vmem:[#allocation6 + $0x248] ss:$16 sps:$4 sm:$0xff]  }
  0xb1   :  { %2166 = vmatpush1.bf16.msra.mxu0 %v3425_v47  ;;  %v444_v49 = vsel %vm435_vm2, %v441_v39, %v443_v43  ;;  %v3493_v47 = vld [vmem:[#allocation6 + $0x664] ss:$16 sps:$4 sm:$0xff]   ;;  %v3494_v29 = vld [vmem:[#allocation6 + $0x268] ss:$16 sps:$4 sm:$0xff]  }
  0xb2   :  { %2167 = vmatprep.subr.bf16.mxu0 %v3433_v56  ;;  %v445_v51 = vsel %vm437_vm3, %v441_v39, %v444_v49  ;;  %v3499_v56 = vld [vmem:[#allocation6 + $0x684] ss:$16 sps:$4 sm:$0xff]   ;;  %v3500_v59 = vld [vmem:[#allocation6 + $0x288] ss:$16 sps:$4 sm:$0xff]  }
  0xb3   :  { %2250 = vmatpush1.bf16.msra.mxu1 %v3434_v30  ;;  %v483_v60 = vrot.slane %v445_v51, %v3935_v58  ;;  %v476_v15 = vcombine.high %v445_v51, %v445_v51  ;;  %v3508_v30 = vld [vmem:[#allocation6 + $0x2ac] ss:$16 sps:$4 sm:$0xff]   ;;  %v3517_v39 = vld [vmem:[#allocation6 + $0x6e4] ss:$16 sps:$4 sm:$0xff]   ;;  %v3518_v21 = vld [vmem:[#allocation6 + $0x2e8] ss:$16 sps:$4 sm:$0xff]  }
  0xb4   :  { %2251 = vmatprep.subr.bf16.mxu1 %v3442_v31  ;;  %v3506_v31 = vld [vmem:[#allocation6 + $0x2a8] ss:$16 sps:$4 sm:$0xff]   ;;  %v3523_v43 = vld [vmem:[#allocation6 + $0x704] ss:$16 sps:$4 sm:$0xff]  }
  0xb5   :  { %2168 = vmatpush1.bf16.msra.mxu0 %v3431_v32  ;;  %v491_v3 = vcombine.high %v483_v60, %v483_v60  ;;  %v4025_v20 = vrot.slane %v476_v15, %v3935_v58  ;;  %v4029_v62 = vpack.c.bf16 %v483_v60, %v483_v60  ;;  %v3484_v58 = vld [vmem:[#allocation6 + $0x22c] ss:$16 sps:$4 sm:$0xff]   ;;  %v3503_v32 = vld [vmem:[#allocation6 + $0x6a0] ss:$16 sps:$4 sm:$0xff]   ;;  %v3524_v49 = vld [vmem:[#allocation6 + $0x308] ss:$16 sps:$4 sm:$0xff]  }
  0xb6   :  { %2169 = vmatprep.subr.bf16.mxu0 %v3439_v36  ;;  %v3509_v36 = vld [vmem:[#allocation6 + $0x6c0] ss:$16 sps:$4 sm:$0xff]   ;;  %v3529_v51 = vld [vmem:[#allocation6 + $0x724] ss:$16 sps:$4 sm:$0xff]   ;;  %v3530_v60 = vld [vmem:[#allocation6 + $0x328] ss:$16 sps:$4 sm:$0xff]  }
  0xb7   :  { %2252 = vmatpush1.bf16.msra.mxu1 %v3440_v37  ;;  %v4021_v9 = vpack.c.bf16 %v491_v3, %v491_v3  ;;  %v492_v54 = vcombine.high %v4025_v20, %v4025_v20  ;;  %v3512_v37 = vld [vmem:[#allocation6 + $0x2c8] ss:$16 sps:$4 sm:$0xff]   ;;  %v3533_v3 = vld [vmem:[#allocation6 + $0x740] ss:$16 sps:$4 sm:$0xff]   ;;  %v3547_v15 = vld [vmem:[#allocation6 + $0x784] ss:$16 sps:$4 sm:$0xff]  }
  0xb8   :  { %2253 = vmatprep.subr.bf16.mxu1 %v3448_v40  ;;  %v3520_v40 = vld [vmem:[#allocation6 + $0x2ec] ss:$16 sps:$4 sm:$0xff]  }
  0xb9   :  { %2170 = vmatpush1.bf16.msra.mxu0 %v3437_v41  ;;  %2181 = vmatprep.mubr.bf16.mxu0 %v4021_v9  ;;  %v4031_v63 = vpack.c.bf16 %v492_v54, %v492_v54  ;;  %v3515_v41 = vld [vmem:[#allocation6 + $0x6e0] ss:$16 sps:$4 sm:$0xff]   ;;  %v3560_v54 = vld [vmem:[#allocation6 + $0x3c8] ss:$16 sps:$4 sm:$0xff]  }
  0xba   :  { %2171 = vmatprep.subr.bf16.mxu0 %v3445_v42  ;;  %v3526_v42 = vld [vmem:[#allocation6 + $0x30c] ss:$16 sps:$4 sm:$0xff]  }
  0xbb   :  { %2254 = vmatpush1.bf16.msra.mxu1 %v3446_v44  ;;  %v3521_v44 = vld [vmem:[#allocation6 + $0x700] ss:$16 sps:$4 sm:$0xff]  }
  0xbc   :  { %2255 = vmatprep.subr.bf16.mxu1 %v3454_v50  ;;  %v3532_v50 = vld [vmem:[#allocation6 + $0x32c] ss:$16 sps:$4 sm:$0xff]  }
  0xbd   :  { %2172 = vmatpush1.bf16.msra.mxu0 %v3443_v52  ;;  %v3527_v52 = vld [vmem:[#allocation6 + $0x720] ss:$16 sps:$4 sm:$0xff]  }
  0xbe   :  { %2173 = vmatprep.subr.bf16.mxu0 %v3451_v0  ;;  %v3538_v0 = vld [vmem:[#allocation6 + $0x34c] ss:$16 sps:$4 sm:$0xff]  }
  0xbf   :  { %2256 = vmatpush1.bf16.msra.mxu1 %v3452_v2  ;;  %v3535_v2 = vld [vmem:[#allocation6 + $0x744] ss:$16 sps:$4 sm:$0xff]  }
  0xc0   :  { %2257 = vmatprep.subr.bf16.mxu1 %v3460_v7  ;;  %v3536_v7 = vld [vmem:[#allocation6 + $0x348] ss:$16 sps:$4 sm:$0xff]  }
  0xc1   :  { %2174 = vmatpush1.bf16.msra.mxu0 %v3449_v8  ;;  %v3544_v8 = vld [vmem:[#allocation6 + $0x36c] ss:$16 sps:$4 sm:$0xff]  }
  0xc2   :  { %2175 = vmatprep.subr.bf16.mxu0 %v3457_v11  ;;  %v3541_v11 = vld [vmem:[#allocation6 + $0x764] ss:$16 sps:$4 sm:$0xff]  }
  0xc3   :  { %2258 = vmatpush1.bf16.msra.mxu1 %v3458_v12  ;;  %v3539_v12 = vld [vmem:[#allocation6 + $0x760] ss:$16 sps:$4 sm:$0xff]  }
  0xc4   :  { %2259 = vmatprep.subr.bf16.mxu1 %v3466_v13  ;;  %v3542_v13 = vld [vmem:[#allocation6 + $0x368] ss:$16 sps:$4 sm:$0xff]  }
  0xc5   :  { %2176 = vmatpush1.bf16.msra.mxu0 %v3455_v14  ;;  %v3550_v14 = vld [vmem:[#allocation6 + $0x38c] ss:$16 sps:$4 sm:$0xff]  }
  0xc6   :  { %2177 = vmatprep.subr.bf16.mxu0 %v3463_v16  ;;  %v3548_v16 = vld [vmem:[#allocation6 + $0x388] ss:$16 sps:$4 sm:$0xff]  }
  0xc7   :  { %2260 = vmatpush1.bf16.msra.mxu1 %v3464_v17  ;;  %v3556_v17 = vld [vmem:[#allocation6 + $0x3ac] ss:$16 sps:$4 sm:$0xff]  }
  0xc8   :  { %2261 = vmatprep.subr.bf16.mxu1 %v3472_v18  ;;  %v3545_v18 = vld [vmem:[#allocation6 + $0x780] ss:$16 sps:$4 sm:$0xff]  }
  0xc9   :  { %2178 = vmatpush1.bf16.msra.mxu0 %v3461_v19  ;;  %v3553_v19 = vld [vmem:[#allocation6 + $0x7a4] ss:$16 sps:$4 sm:$0xff]  }
  0xca   :  { %2179 = vmatprep.subr.bf16.mxu0 %v3469_v22  ;;  %v3554_v22 = vld [vmem:[#allocation6 + $0x3a8] ss:$16 sps:$4 sm:$0xff]  }
  0xcb   :  { %2262 = vmatpush1.bf16.msra.mxu1 %v3470_v23  ;;  %v3562_v23 = vld [vmem:[#allocation6 + $0x3cc] ss:$16 sps:$4 sm:$0xff]  }
  0xcc   :  { %2272 = vmatprep.subr.bf16.mxu1 %v3478_v24  ;;  %v3551_v24 = vld [vmem:[#allocation6 + $0x7a0] ss:$16 sps:$4 sm:$0xff]  }
  0xcd   :  { %2180 = vmatpush1.bf16.msra.mxu0 %v3467_v25  ;;  %v3559_v25 = vld [vmem:[#allocation6 + $0x7c4] ss:$16 sps:$4 sm:$0xff]  }
  0xce   :  { %2190 = vmatprep.subr.bf16.mxu0 %v3475_v55  ;;  %2264 = vmatmul.mubr.bf16.vlgmr.msra.gmra.mrb[4].mxu1 %v3979_v33  ;;  %v3485_v33 = vld [vmem:[#allocation6 + $0x640] ss:$16 sps:$4 sm:$0xff]   ;;  %v3568_v55 = vld [vmem:[#allocation6 + $0x3ec] ss:$16 sps:$4 sm:$0xff]  }
  0xcf   :  { %2273 = vmatpush1.bf16.msra.mxu1 %v3476_v61  ;;  %2304 = vmatprep.mubr.bf16.mxu1 %v3983_v6  ;;  %v3491_v6 = vld [vmem:[#allocation6 + $0x660] ss:$16 sps:$4 sm:$0xff]  }
  0xd0   :  { %2182 = vmatmul.mubr.bf16.vlgmr.msra.gmra.mrb[0].mxu0 %v4029_v62  ;;  %2274 = vmatprep.subr.bf16.mxu1 %v3484_v58  ;;  %v3557_v61 = vld [vmem:[#allocation6 + $0x7c0] ss:$16 sps:$4 sm:$0xff]   ;;  %v3565_v58 = vld [vmem:[#allocation6 + $0x7e4] ss:$16 sps:$4 sm:$0xff]  }
  0xd1   :  { %2191 = vmatpush1.bf16.msra.mxu0 %v3473_v26  ;;  %2222 = vmatprep.mubr.bf16.mxu0 %v4031_v63  ;;  %v3566_v26 = vld [vmem:[#allocation6 + $0x3e8] ss:$16 sps:$4 sm:$0xff]  }
  0xd2   :  { %2192 = vmatprep.subr.bf16.mxu0 %v3481_v4  ;;  %v3571_v4 = vld [vmem:[#allocation6 + $0x40c] ss:$16 sps:$4 sm:$0xff]  }
  0xd3   :  { %2275 = vmatpush1.bf16.msra.mxu1 %v3482_v5  ;;  %v3563_v5 = vld [vmem:[#allocation6 + $0x7e0] ss:$16 sps:$4 sm:$0xff]  }
  0xd4   :  { %2276 = vmatprep.subr.bf16.mxu1 %v3490_v10  ;;  %v3569_v10 = vld [vmem:[#allocation6 + $0x408] ss:$16 sps:$4 sm:$0xff]  }
  0xd5   :  { %2193 = vmatpush1.bf16.msra.mxu0 %v3479_v27  ;;  %v4039_v27 = vpack.c.bf16 %v4025_v20, %v4025_v20  ;;  %v3668_v20 = vld [vmem:[#allocation8 + $0x10] ss:$8 sps:$4 sm:$0xff]  }
  0xd6   :  { %2194 = vmatprep.subr.bf16.mxu0 %v3487_v45  ;;  %v3574_v45 = vld [vmem:[#allocation6 + $0x42c] ss:$16 sps:$4 sm:$0xff]  }
  0xd7   :  { %2277 = vmatpush1.bf16.msra.mxu1 %v3488_v46  ;;  %v3665_v46 = vld [vmem:[#allocation8] ss:$8 sps:$4 sm:$0xff]  }
  0xd8   :  { %2278 = vmatprep.subr.bf16.mxu1 %v3496_v28  ;;  %v3667_v28 = vld [vmem:[#allocation8 + $0x4] ss:$8 sps:$4 sm:$0xff]  }
  0xd9   :  { %2195 = vmatpush1.bf16.msra.mxu0 %v3485_v33  ;;  %v3572_v33 = vld [vmem:[#allocation6 + $0x428] ss:$16 sps:$4 sm:$0xff]  }
  0xda   :  { %2196 = vmatprep.subr.bf16.mxu0 %v3493_v47  ;;  %v3670_v47 = vld [vmem:[#allocation8 + $0x14] ss:$8 sps:$4 sm:$0xff]  }
  0xdb   :  { %2279 = vmatpush1.bf16.msra.mxu1 %v3494_v29  ;;  %v3575_v29 = vld [vmem:[#allocation6 + $0x448] ss:$16 sps:$4 sm:$0xff]  }
  0xdc   :  { %2280 = vmatprep.subr.bf16.mxu1 %v3502_v53  ;;  %v3673_v53 = vld [vmem:[#allocation8 + $0x24] ss:$8 sps:$4 sm:$0xff]  }
  0xdd   :  { %2197 = vmatpush1.bf16.msra.mxu0 %v3491_v6  ;;  %v3577_v6 = vld [vmem:[#allocation6 + $0x44c] ss:$16 sps:$4 sm:$0xff]  }
  0xde   :  { %2198 = vmatprep.subr.bf16.mxu0 %v3499_v56  ;;  %v3671_v56 = vld [vmem:[#allocation8 + $0x20] ss:$8 sps:$4 sm:$0xff]  }
  0xdf   :  { %2281 = vmatpush1.bf16.msra.mxu1 %v3500_v59  ;;  %v3583_v59 = vld [vmem:[#allocation6 + $0x48c] ss:$16 sps:$4 sm:$0xff]  }
  0xe0   :  { %2282 = vmatprep.subr.bf16.mxu1 %v3508_v30  ;;  %v3674_v30 = vld [vmem:[#allocation8 + $0x30] ss:$8 sps:$4 sm:$0xff]  }
  0xe1   :  { %2199 = vmatpush1.bf16.msra.mxu0 %v3497_v57  ;;  %v3578_v57 = vld [vmem:[#allocation6 + $0x468] ss:$16 sps:$4 sm:$0xff]  }
  0xe2   :  { %2200 = vmatprep.subr.bf16.mxu0 %v3505_v1  ;;  %v3581_v1 = vld [vmem:[#allocation6 + $0x488] ss:$16 sps:$4 sm:$0xff]  }
  0xe3   :  { %2283 = vmatpush1.bf16.msra.mxu1 %v3506_v31  ;;  %v3679_v31 = vld [vmem:[#allocation8 + $0x44] ss:$8 sps:$4 sm:$0xff]  }
  0xe4   :  { %2284 = vmatprep.subr.bf16.mxu1 %v3514_v34  ;;  %v3677_v34 = vld [vmem:[#allocation8 + $0x40] ss:$8 sps:$4 sm:$0xff]  }
  0xe5   :  { %2201 = vmatpush1.bf16.msra.mxu0 %v3503_v32  ;;  %v3586_v32 = vld [vmem:[#allocation6 + $0x4ac] ss:$16 sps:$4 sm:$0xff]  }
  0xe6   :  { %2202 = vmatprep.subr.bf16.mxu0 %v3511_v35  ;;  %v3584_v35 = vld [vmem:[#allocation6 + $0x4a8] ss:$16 sps:$4 sm:$0xff]  }
  0xe7   :  { %2285 = vmatpush1.bf16.msra.mxu1 %v3512_v37  ;;  %v3589_v37 = vld [vmem:[#allocation6 + $0x4cc] ss:$16 sps:$4 sm:$0xff]  }
  0xe8   :  { %2286 = vmatprep.subr.bf16.mxu1 %v3520_v40  ;;  %v3587_v40 = vld [vmem:[#allocation6 + $0x4c8] ss:$16 sps:$4 sm:$0xff]  }
  0xe9   :  { %2203 = vmatpush1.bf16.msra.mxu0 %v3509_v36  ;;  %v3682_v36 = vld [vmem:[#allocation8 + $0x54] ss:$8 sps:$4 sm:$0xff]  }
  0xea   :  { %2204 = vmatprep.subr.bf16.mxu0 %v3517_v39  ;;  %v3680_v39 = vld [vmem:[#allocation8 + $0x50] ss:$8 sps:$4 sm:$0xff]  }
  0xeb   :  { %2287 = vmatpush1.bf16.msra.mxu1 %v3518_v21  ;;  %v3592_v21 = vld [vmem:[#allocation6 + $0x4ec] ss:$16 sps:$4 sm:$0xff]  }
  0xec   :  { %2288 = vmatprep.subr.bf16.mxu1 %v3526_v42  ;;  %v3683_v42 = vld [vmem:[#allocation8 + $0x60] ss:$8 sps:$4 sm:$0xff]  }
  0xed   :  { %2205 = vmatpush1.bf16.msra.mxu0 %v3515_v41  ;;  %v3685_v41 = vld [vmem:[#allocation8 + $0x64] ss:$8 sps:$4 sm:$0xff]  }
  0xee   :  { %2206 = vmatprep.subr.bf16.mxu0 %v3523_v43  ;;  %v3590_v43 = vld [vmem:[#allocation6 + $0x4e8] ss:$16 sps:$4 sm:$0xff]  }
  0xef   :  { %2289 = vmatpush1.bf16.msra.mxu1 %v3524_v49  ;;  %v3595_v49 = vld [vmem:[#allocation6 + $0x50c] ss:$16 sps:$4 sm:$0xff]  }
  0xf0   :  { %2290 = vmatprep.subr.bf16.mxu1 %v3532_v50  ;;  %v3686_v50 = vld [vmem:[#allocation8 + $0x70] ss:$8 sps:$4 sm:$0xff]  }
  0xf1   :  { %2207 = vmatpush1.bf16.msra.mxu0 %v3521_v44  ;;  %v3688_v44 = vld [vmem:[#allocation8 + $0x74] ss:$8 sps:$4 sm:$0xff]  }
  0xf2   :  { %2208 = vmatprep.subr.bf16.mxu0 %v3529_v51  ;;  %v3593_v51 = vld [vmem:[#allocation6 + $0x508] ss:$16 sps:$4 sm:$0xff]  }
  0xf3   :  { %2291 = vmatpush1.bf16.msra.mxu1 %v3530_v60  ;;  %v3598_v60 = vld [vmem:[#allocation6 + $0x52c] ss:$16 sps:$4 sm:$0xff]  }
  0xf4   :  { %2292 = vmatprep.subr.bf16.mxu1 %v3538_v0  ;;  %v3689_v0 = vld [vmem:[#allocation8 + $0x80] ss:$8 sps:$4 sm:$0xff]  }
  0xf5   :  { %2209 = vmatpush1.bf16.msra.mxu0 %v3527_v52  ;;  %v3691_v52 = vld [vmem:[#allocation8 + $0x84] ss:$8 sps:$4 sm:$0xff]  }
  0xf6   :  { %2210 = vmatprep.subr.bf16.mxu0 %v3535_v2  ;;  %v3596_v2 = vld [vmem:[#allocation6 + $0x528] ss:$16 sps:$4 sm:$0xff]  }
  0xf7   :  { %2293 = vmatpush1.bf16.msra.mxu1 %v3536_v7  ;;  %v3601_v7 = vld [vmem:[#allocation6 + $0x54c] ss:$16 sps:$4 sm:$0xff]  }
  0xf8   :  { %2294 = vmatprep.subr.bf16.mxu1 %v3544_v8  ;;  %v3692_v8 = vld [vmem:[#allocation8 + $0x90] ss:$8 sps:$4 sm:$0xff]  }
  0xf9   :  { %2211 = vmatpush1.bf16.msra.mxu0 %v3533_v3  ;;  %v3694_v3 = vld [vmem:[#allocation8 + $0x94] ss:$8 sps:$4 sm:$0xff]  }
  0xfa   :  { %2212 = vmatprep.subr.bf16.mxu0 %v3541_v11  ;;  %v3599_v11 = vld [vmem:[#allocation6 + $0x548] ss:$16 sps:$4 sm:$0xff]  }
  0xfb   :  { %2295 = vmatpush1.bf16.msra.mxu1 %v3542_v13  ;;  %v3604_v13 = vld [vmem:[#allocation6 + $0x56c] ss:$16 sps:$4 sm:$0xff]  }
  0xfc   :  { %2296 = vmatprep.subr.bf16.mxu1 %v3550_v14  ;;  %v3695_v14 = vld [vmem:[#allocation8 + $0xa0] ss:$8 sps:$4 sm:$0xff]  }
  0xfd   :  { %2213 = vmatpush1.bf16.msra.mxu0 %v3539_v12  ;;  %v3697_v12 = vld [vmem:[#allocation8 + $0xa4] ss:$8 sps:$4 sm:$0xff]  }
  0xfe   :  { %2214 = vmatprep.subr.bf16.mxu0 %v3547_v15  ;;  %v3602_v15 = vld [vmem:[#allocation6 + $0x568] ss:$16 sps:$4 sm:$0xff]  }
  0xff   :  { %2297 = vmatpush1.bf16.msra.mxu1 %v3548_v16  ;;  %v3700_v16 = vld [vmem:[#allocation8 + $0xb4] ss:$8 sps:$4 sm:$0xff]  }
 0x100   :  { %2298 = vmatprep.subr.bf16.mxu1 %v3556_v17  ;;  %v3607_v17 = vld [vmem:[#allocation6 + $0x58c] ss:$16 sps:$4 sm:$0xff]  }
 0x101   :  { %2215 = vmatpush1.bf16.msra.mxu0 %v3545_v18  ;;  %v3698_v18 = vld [vmem:[#allocation8 + $0xb0] ss:$8 sps:$4 sm:$0xff]  }
 0x102   :  { %2216 = vmatprep.subr.bf16.mxu0 %v3553_v19  ;;  %v3605_v19 = vld [vmem:[#allocation6 + $0x588] ss:$16 sps:$4 sm:$0xff]  }
 0x103   :  { %2299 = vmatpush1.bf16.msra.mxu1 %v3554_v22  ;;  %v3703_v22 = vld [vmem:[#allocation8 + $0xc4] ss:$8 sps:$4 sm:$0xff]  }
 0x104   :  { %2300 = vmatprep.subr.bf16.mxu1 %v3562_v23  ;;  %v3610_v23 = vld [vmem:[#allocation6 + $0x5ac] ss:$16 sps:$4 sm:$0xff]  }
 0x105   :  { %2217 = vmatpush1.bf16.msra.mxu0 %v3551_v24  ;;  %v3701_v24 = vld [vmem:[#allocation8 + $0xc0] ss:$8 sps:$4 sm:$0xff]  }
 0x106   :  { %2218 = vmatprep.subr.bf16.mxu0 %v3559_v25  ;;  %v3608_v25 = vld [vmem:[#allocation6 + $0x5a8] ss:$16 sps:$4 sm:$0xff]  }
 0x107   :  { %2301 = vmatpush1.bf16.msra.mxu1 %v3560_v54  ;;  %v3706_v54 = vld [vmem:[#allocation8 + $0xd4] ss:$8 sps:$4 sm:$0xff]  }
 0x108   :  { %2302 = vmatprep.subr.bf16.mxu1 %v3568_v55  ;;  %v3613_v55 = vld [vmem:[#allocation6 + $0x5cc] ss:$16 sps:$4 sm:$0xff]  }
 0x109   :  { %2219 = vmatpush1.bf16.msra.mxu0 %v3557_v61  ;;  %v3704_v61 = vld [vmem:[#allocation8 + $0xd0] ss:$8 sps:$4 sm:$0xff]  }
 0x10a   :  { %2220 = vmatprep.subr.bf16.mxu0 %v3565_v58  ;;  %v3611_v58 = vld [vmem:[#allocation6 + $0x5c8] ss:$16 sps:$4 sm:$0xff]  }
 0x10b   :  { %2303 = vmatpush1.bf16.msra.mxu1 %v3566_v26  ;;  %v3616_v26 = vld [vmem:[#allocation6 + $0x5ec] ss:$16 sps:$4 sm:$0xff]  }
 0x10c   :  { %2313 = vmatprep.subr.bf16.mxu1 %v3571_v4  ;;  %v3614_v4 = vld [vmem:[#allocation6 + $0x5e8] ss:$16 sps:$4 sm:$0xff]  }
 0x10d   :  { %2221 = vmatpush1.bf16.msra.mxu0 %v3563_v5  ;;  %v3619_v5 = vld [vmem:[#allocation6 + $0x60c] ss:$16 sps:$4 sm:$0xff]  }
 0x10e   :  { %2305 = vmatmul.mubr.bf16.vlgmr.msra.gmra.mrb[4].mxu1 %v3981_v38  ;;  %2807 = vmatprep.subr.bf16.mxu0 %v3667_v28  ;;  %v3580_v38 = vld [vmem:[#allocation6 + $0x46c] ss:$16 sps:$4 sm:$0xff]  }
 0x10f   :  { %2314 = vmatpush1.bf16.msra.mxu1 %v3569_v10  ;;  %2345 = vmatprep.mubr.bf16.mxu1 %v4021_v9  ;;  %v3676_v9 = vld [vmem:[#allocation8 + $0x34] ss:$8 sps:$4 sm:$0xff]   ;;  %v3617_v10 = vld [vmem:[#allocation6 + $0x608] ss:$16 sps:$4 sm:$0xff]  }
 0x110   :  { %2223 = vmatmul.mubr.bf16.vlgmr.msra.gmra.mrb[0].mxu0 %v4039_v27  ;;  %2315 = vmatprep.subr.bf16.mxu1 %v3574_v45  ;;  %v3622_v45 = vld [vmem:[#allocation6 + $0x62c] ss:$16 sps:$4 sm:$0xff]  }
 0x111   :  { %2808 = vmatpush1.bf16.msra.mxu0 %v3665_v46  ;;  %v3620_v46 = vld [vmem:[#allocation6 + $0x628] ss:$16 sps:$4 sm:$0xff]   ;;  %v3625_v28 = vld [vmem:[#allocation6 + $0x64c] ss:$16 sps:$4 sm:$0xff]  }
 0x112   :  { %2809 = vmatprep.subr.bf16.mxu0 %v3670_v47  ;;  %v3628_v47 = vld [vmem:[#allocation6 + $0x66c] ss:$16 sps:$4 sm:$0xff]  }
 0x113   :  { %2316 = vmatpush1.bf16.msra.mxu1 %v3572_v33  ;;  %v3623_v33 = vld [vmem:[#allocation6 + $0x648] ss:$16 sps:$4 sm:$0xff]  }
 0x114   :  { %2317 = vmatprep.subr.bf16.mxu1 %v3577_v6  ;;  %v3626_v6 = vld [vmem:[#allocation6 + $0x668] ss:$16 sps:$4 sm:$0xff]  }
 0x115   :  { %2810 = vmatpush1.bf16.msra.mxu0 %v3668_v20  ;;  %v3631_v20 = vld [vmem:[#allocation6 + $0x68c] ss:$16 sps:$4 sm:$0xff]  }
 0x116   :  { %2811 = vmatprep.subr.bf16.mxu0 %v3673_v53  ;;  %v3634_v53 = vld [vmem:[#allocation6 + $0x6ac] ss:$16 sps:$4 sm:$0xff]  }
 0x117   :  { %2318 = vmatpush1.bf16.msra.mxu1 %v3575_v29  ;;  %v3629_v29 = vld [vmem:[#allocation6 + $0x688] ss:$16 sps:$4 sm:$0xff]  }
 0x118   :  { %2319 = vmatprep.subr.bf16.mxu1 %v3580_v38  ;;  %v3637_v38 = vld [vmem:[#allocation6 + $0x6cc] ss:$16 sps:$4 sm:$0xff]  }
 0x119   :  { %2812 = vmatpush1.bf16.msra.mxu0 %v3671_v56 }
 0x11a   :  { %2813 = vmatprep.subr.bf16.mxu0 %v3676_v9  ;;  %v3635_v9 = vld [vmem:[#allocation6 + $0x6c8] ss:$16 sps:$4 sm:$0xff]  }
 0x11b   :  { %2320 = vmatpush1.bf16.msra.mxu1 %v3578_v57 }
 0x11c   :  { %2321 = vmatprep.subr.bf16.mxu1 %v3583_v59  ;;  %v3709_v59 = vld [vmem:[#allocation8 + $0xe4] ss:$8 sps:$4 sm:$0xff]  }
 0x11d   :  { %2814 = vmatpush1.bf16.msra.mxu0 %v3674_v30 }
 0x11e   :  { %2815 = vmatprep.subr.bf16.mxu0 %v3679_v31  ;;  %v3707_v31 = vld [vmem:[#allocation8 + $0xe0] ss:$8 sps:$4 sm:$0xff]  }
 0x11f   :  { %2322 = vmatpush1.bf16.msra.mxu1 %v3581_v1  ;;  %v3640_v1 = vld [vmem:[#allocation6 + $0x6ec] ss:$16 sps:$4 sm:$0xff]  }
 0x120   :  { %2323 = vmatprep.subr.bf16.mxu1 %v3586_v32  ;;  %v3638_v32 = vld [vmem:[#allocation6 + $0x6e8] ss:$16 sps:$4 sm:$0xff]  }
 0x121   :  { %2816 = vmatpush1.bf16.msra.mxu0 %v3677_v34  ;;  %v3712_v34 = vld [vmem:[#allocation8 + $0xf4] ss:$8 sps:$4 sm:$0xff]  }
 0x122   :  { %2817 = vmatprep.subr.bf16.mxu0 %v3682_v36  ;;  %v3710_v36 = vld [vmem:[#allocation8 + $0xf0] ss:$8 sps:$4 sm:$0xff]  }
 0x123   :  { %2324 = vmatpush1.bf16.msra.mxu1 %v3584_v35  ;;  %v3643_v35 = vld [vmem:[#allocation6 + $0x70c] ss:$16 sps:$4 sm:$0xff]  }
 0x124   :  { %2325 = vmatprep.subr.bf16.mxu1 %v3589_v37  ;;  %v3641_v37 = vld [vmem:[#allocation6 + $0x708] ss:$16 sps:$4 sm:$0xff]  }
 0x125   :  { %2818 = vmatpush1.bf16.msra.mxu0 %v3680_v39  ;;  %v3646_v39 = vld [vmem:[#allocation6 + $0x72c] ss:$16 sps:$4 sm:$0xff]  }
 0x126   :  { %2819 = vmatprep.subr.bf16.mxu0 %v3685_v41  ;;  %v3644_v41 = vld [vmem:[#allocation6 + $0x728] ss:$16 sps:$4 sm:$0xff]  }
 0x127   :  { %2326 = vmatpush1.bf16.msra.mxu1 %v3587_v40  ;;  %v3715_v40 = vld [vmem:[#allocation8 + $0x104] ss:$8 sps:$4 sm:$0xff]  }
 0x128   :  { %2327 = vmatprep.subr.bf16.mxu1 %v3592_v21  ;;  %v3649_v21 = vld [vmem:[#allocation6 + $0x74c] ss:$16 sps:$4 sm:$0xff]  }
 0x129   :  { %2820 = vmatpush1.bf16.msra.mxu0 %v3683_v42  ;;  %v3647_v42 = vld [vmem:[#allocation6 + $0x748] ss:$16 sps:$4 sm:$0xff]  }
 0x12a   :  { %2821 = vmatprep.subr.bf16.mxu0 %v3688_v44  ;;  %v3650_v44 = vld [vmem:[#allocation6 + $0x768] ss:$16 sps:$4 sm:$0xff]  }
 0x12b   :  { %2328 = vmatpush1.bf16.msra.mxu1 %v3590_v43  ;;  %v3652_v43 = vld [vmem:[#allocation6 + $0x76c] ss:$16 sps:$4 sm:$0xff]  }
 0x12c   :  { %2329 = vmatprep.subr.bf16.mxu1 %v3595_v49  ;;  %v3655_v49 = vld [vmem:[#allocation6 + $0x78c] ss:$16 sps:$4 sm:$0xff]  }
 0x12d   :  { %2822 = vmatpush1.bf16.msra.mxu0 %v3686_v50  ;;  %v3653_v50 = vld [vmem:[#allocation6 + $0x788] ss:$16 sps:$4 sm:$0xff]  }
 0x12e   :  { %2823 = vmatprep.subr.bf16.mxu0 %v3691_v52  ;;  %v3656_v52 = vld [vmem:[#allocation6 + $0x7a8] ss:$16 sps:$4 sm:$0xff]  }
 0x12f   :  { %2330 = vmatpush1.bf16.msra.mxu1 %v3593_v51  ;;  %v3658_v51 = vld [vmem:[#allocation6 + $0x7ac] ss:$16 sps:$4 sm:$0xff]  }
 0x130   :  { %2331 = vmatprep.subr.bf16.mxu1 %v3598_v60  ;;  %v3661_v60 = vld [vmem:[#allocation6 + $0x7cc] ss:$16 sps:$4 sm:$0xff]  }
 0x131   :  { %2824 = vmatpush1.bf16.msra.mxu0 %v3689_v0  ;;  %v3659_v0 = vld [vmem:[#allocation6 + $0x7c8] ss:$16 sps:$4 sm:$0xff]  }
 0x132   :  { %2825 = vmatprep.subr.bf16.mxu0 %v3694_v3  ;;  %v3662_v3 = vld [vmem:[#allocation6 + $0x7e8] ss:$16 sps:$4 sm:$0xff]  }
 0x133   :  { %2332 = vmatpush1.bf16.msra.mxu1 %v3596_v2  ;;  %v3664_v2 = vld [vmem:[#allocation6 + $0x7ec] ss:$16 sps:$4 sm:$0xff]  }
 0x134   :  { %2333 = vmatprep.subr.bf16.mxu1 %v3601_v7  ;;  %v769_v7 = vsub.s32 0, %v3932_v48 }
 0x135   :  { %2826 = vmatpush1.bf16.msra.mxu0 %v3692_v8  ;;  %v4051_v8 = vld [vmem:[%s4085_s2] sm:$0xf] }
 0x136   :  { %2827 = vmatprep.subr.bf16.mxu0 %v3697_v12  ;;  %v770_v12 = vrot.slane %v4051_v8, %v769_v7 }
 0x137   :  { %2334 = vmatpush1.bf16.msra.mxu1 %v3599_v11  ;;  %v773_v11 = vsub.s32 1, %v3932_v48 }
 0x138   :  { %2335 = vmatprep.subr.bf16.mxu1 %v3604_v13 }
 0x139   :  { %2828 = vmatpush1.bf16.msra.mxu0 %v3695_v14  ;;  %v774_v13 = vrot.slane %v4051_v8, %v773_v11 }
 0x13a   :  { %2829 = vmatprep.subr.bf16.mxu0 %v3700_v16 }
 0x13b   :  { %2336 = vmatpush1.bf16.msra.mxu1 %v3602_v15 }
 0x13c   :  { %2337 = vmatprep.subr.bf16.mxu1 %v3607_v17 }
 0x13d   :  { %2830 = vmatpush1.bf16.msra.mxu0 %v3698_v18 }
 0x13e   :  { %2831 = vmatprep.subr.bf16.mxu0 %v3703_v22 }
 0x13f   :  { %2338 = vmatpush1.bf16.msra.mxu1 %v3605_v19 }
 0x140   :  { %2339 = vmatprep.subr.bf16.mxu1 %v3610_v23 }
 0x141   :  { %2832 = vmatpush1.bf16.msra.mxu0 %v3701_v24 }
 0x142   :  { %2833 = vmatprep.subr.bf16.mxu0 %v3706_v54 }
 0x143   :  { %2340 = vmatpush1.bf16.msra.mxu1 %v3608_v25 }
 0x144   :  { %2341 = vmatprep.subr.bf16.mxu1 %v3613_v55 }
 0x145   :  { %2834 = vmatpush1.bf16.msra.mxu0 %v3704_v61  ;;  %v3713_v61 = vld [vmem:[#allocation8 + $0x100] ss:$8 sps:$4 sm:$0xff]  }
 0x146   :  { %2835 = vmatprep.subr.bf16.mxu0 %v3709_v59  ;;  %v3743_v59 = vld [vmem:[#allocation8 + $0x1a0] ss:$8 sps:$4 sm:$0xff]  }
 0x147   :  { %2342 = vmatpush1.bf16.msra.mxu1 %v3611_v58 }
 0x148   :  { %2343 = vmatprep.subr.bf16.mxu1 %v3616_v26  ;;  %v3718_v26 = vld [vmem:[#allocation8 + $0x114] ss:$8 sps:$4 sm:$0xff]  }
 0x149   :  { %2836 = vmatpush1.bf16.msra.mxu0 %v3707_v31  ;;  %v3751_v31 = vld [vmem:[#allocation8 + $0x1c4] ss:$8 sps:$4 sm:$0xff]  }
 0x14a   :  { %2837 = vmatprep.subr.bf16.mxu0 %v3712_v34  ;;  %v3754_v34 = vld [vmem:[#allocation8 + $0x1d4] ss:$8 sps:$4 sm:$0xff]  }
 0x14b   :  { %2344 = vmatpush1.bf16.msra.mxu1 %v3614_v4  ;;  %v3716_v4 = vld [vmem:[#allocation8 + $0x110] ss:$8 sps:$4 sm:$0xff]  }
 0x14c   :  { %2354 = vmatprep.subr.bf16.mxu1 %v3619_v5  ;;  %v3721_v5 = vld [vmem:[#allocation8 + $0x124] ss:$8 sps:$4 sm:$0xff]  }
 0x14d   :  { %2838 = vmatpush1.bf16.msra.mxu0 %v3710_v36  ;;  %v3757_v36 = vld [vmem:[#allocation8 + $0x1e4] ss:$8 sps:$4 sm:$0xff]  }
 0x14e   :  { %2346 = vmatmul.mubr.bf16.vlgmr.msra.gmra.mrb[4].mxu1 %v4029_v62  ;;  %v3632_v62 = vld [vmem:[#allocation6 + $0x6a8] ss:$16 sps:$4 sm:$0xff]   ;;  %2848 = vmatprep.subr.bf16.mxu0 %v3715_v40 }
 0x14f   :  { %2355 = vmatpush1.bf16.msra.mxu1 %v3617_v10  ;;  %2386 = vmatprep.mubr.bf16.mxu1 %v4031_v63  ;;  %v3719_v10 = vld [vmem:[#allocation8 + $0x120] ss:$8 sps:$4 sm:$0xff]   ;;  %v3758_v40 = vld [vmem:[#allocation8 + $0x1f0] ss:$8 sps:$4 sm:$0xff]  }
 0x150   :  { %2356 = vmatprep.subr.bf16.mxu1 %v3622_v45  ;;  %v3724_v45 = vld [vmem:[#allocation8 + $0x134] ss:$8 sps:$4 sm:$0xff]  }
 0x153   :  { %2357 = vmatpush1.bf16.msra.mxu1 %v3620_v46  ;;  %v3722_v46 = vld [vmem:[#allocation8 + $0x130] ss:$8 sps:$4 sm:$0xff]  }
 0x154   :  { %2358 = vmatprep.subr.bf16.mxu1 %v3625_v28  ;;  %v3727_v28 = vld [vmem:[#allocation8 + $0x144] ss:$8 sps:$4 sm:$0xff]  }
 0x157   :  { %2359 = vmatpush1.bf16.msra.mxu1 %v3623_v33  ;;  %v3725_v33 = vld [vmem:[#allocation8 + $0x140] ss:$8 sps:$4 sm:$0xff]  }
 0x158   :  { %2360 = vmatprep.subr.bf16.mxu1 %v3628_v47  ;;  %v3730_v47 = vld [vmem:[#allocation8 + $0x154] ss:$8 sps:$4 sm:$0xff]  }
 0x15b   :  { %2361 = vmatpush1.bf16.msra.mxu1 %v3626_v6  ;;  %v3728_v6 = vld [vmem:[#allocation8 + $0x150] ss:$8 sps:$4 sm:$0xff]  }
 0x15c   :  { %2362 = vmatprep.subr.bf16.mxu1 %v3631_v20  ;;  %v3733_v20 = vld [vmem:[#allocation8 + $0x164] ss:$8 sps:$4 sm:$0xff]  }
 0x15f   :  { %2363 = vmatpush1.bf16.msra.mxu1 %v3629_v29  ;;  %v3731_v29 = vld [vmem:[#allocation8 + $0x160] ss:$8 sps:$4 sm:$0xff]  }
 0x160   :  { %2364 = vmatprep.subr.bf16.mxu1 %v3634_v53  ;;  %v3736_v53 = vld [vmem:[#allocation8 + $0x174] ss:$8 sps:$4 sm:$0xff]  }
 0x161   :  { %v2101_v56 = vpop.f32.mrb[0].mxu1 }
 0x162   :  { %v2103_v63 = vpop.f32.mrb[1].mxu1  ;;  %v2102_v14 = vadd.f32 %v2101_v56, %v770_v12  ;;  %v3737_v56 = vld [vmem:[#allocation8 + $0x180] ss:$8 sps:$4 sm:$0xff]  }
 0x163   :  { %v2105_v57 = vpop.f32.mrb[2].mxu1  ;;  %2365 = vmatpush1.bf16.msra.mxu1 %v3632_v62  ;;  %v2104_v15 = vadd.f32 %v2103_v63, %v774_v13  ;;  %v3734_v62 = vld [vmem:[#allocation8 + $0x170] ss:$8 sps:$4 sm:$0xff]   ;;  %v3742_v63 = vld [vmem:[#allocation8 + $0x194] ss:$8 sps:$4 sm:$0xff]  }
 0x164   :  { %v2106_v30 = vpop.f32.mrb[3].mxu1  ;;  %2366 = vmatprep.subr.bf16.mxu1 %v3637_v38  ;;  %v3739_v38 = vld [vmem:[#allocation8 + $0x184] ss:$8 sps:$4 sm:$0xff]   ;;  %v3740_v57 = vld [vmem:[#allocation8 + $0x190] ss:$8 sps:$4 sm:$0xff]  }
 0x165   :  { %v3748_v30 = vld [vmem:[#allocation8 + $0x1b4] ss:$8 sps:$4 sm:$0xff]  }
 0x167   :  { %2367 = vmatpush1.bf16.msra.mxu1 %v3635_v9  ;;  %v3745_v9 = vld [vmem:[#allocation8 + $0x1a4] ss:$8 sps:$4 sm:$0xff]  }
 0x168   :  { %2368 = vmatprep.subr.bf16.mxu1 %v3640_v1  ;;  %v3746_v1 = vld [vmem:[#allocation8 + $0x1b0] ss:$8 sps:$4 sm:$0xff]  }
 0x16b   :  { %2369 = vmatpush1.bf16.msra.mxu1 %v3638_v32  ;;  %v3749_v32 = vld [vmem:[#allocation8 + $0x1c0] ss:$8 sps:$4 sm:$0xff]  }
 0x16c   :  { %2370 = vmatprep.subr.bf16.mxu1 %v3643_v35  ;;  %v3752_v35 = vld [vmem:[#allocation8 + $0x1d0] ss:$8 sps:$4 sm:$0xff]  }
 0x16f   :  { %2371 = vmatpush1.bf16.msra.mxu1 %v3641_v37  ;;  %v3755_v37 = vld [vmem:[#allocation8 + $0x1e0] ss:$8 sps:$4 sm:$0xff]  }
 0x170   :  { %2372 = vmatprep.subr.bf16.mxu1 %v3646_v39  ;;  %v3760_v39 = vld [vmem:[#allocation8 + $0x1f4] ss:$8 sps:$4 sm:$0xff]  }
 0x173   :  { %2373 = vmatpush1.bf16.msra.mxu1 %v3644_v41  ;;  %v777_v41 = vsub.s32 2, %v3932_v48 }
 0x174   :  { %2374 = vmatprep.subr.bf16.mxu1 %v3649_v21  ;;  %v781_v21 = vsub.s32 3, %v3932_v48 }
 0x177   :  { %2375 = vmatpush1.bf16.msra.mxu1 %v3647_v42  ;;  %v778_v42 = vrot.slane %v4051_v8, %v777_v41 }
 0x178   :  { %2376 = vmatprep.subr.bf16.mxu1 %v3652_v43  ;;  %v782_v43 = vrot.slane %v4051_v8, %v781_v21  ;;  %v2475_v8 = vld [vmem:[%s4087_s4] sm:$0x3] }
 0x17b   :  { %2377 = vmatpush1.bf16.msra.mxu1 %v3650_v44 }
 0x17c   :  { %2378 = vmatprep.subr.bf16.mxu1 %v3655_v49 }
 0x17f   :  { %2379 = vmatpush1.bf16.msra.mxu1 %v3653_v50 }
 0x180   :  { %2380 = vmatprep.subr.bf16.mxu1 %v3658_v51 }
 0x183   :  { %2381 = vmatpush1.bf16.msra.mxu1 %v3656_v52 }
 0x184   :  { %2382 = vmatprep.subr.bf16.mxu1 %v3661_v60 }
 0x187   :  { %2383 = vmatpush1.bf16.msra.mxu1 %v3659_v0 }
 0x188   :  { %2384 = vmatprep.subr.bf16.mxu1 %v3664_v2 }
 0x18b   :  { %2385 = vmatpush1.bf16.msra.mxu1 %v3662_v3 }
 0x18e   :  { %2387 = vmatmul.mubr.bf16.vlgmr.msra.gmra.mrb[4].mxu1 %v4039_v27 }
 0x1e3   :  { %v2224_v27 = vpop.f32.mrb[0].mxu0 }
 0x1e4   :  { %v3239_v16 = vadd.f32 %v2224_v27, %v2102_v14  ;;  %v2226_v17 = vpop.f32.mrb[1].mxu0  ;;  %v2484_v27 = vrot.slane %v2475_v8, %v773_v11 }
 0x1e5   :  { %v3241_v18 = vadd.f32 %v2226_v17, %v2104_v15  ;;  %v2228_v19 = vpop.f32.mrb[2].mxu0  ;;  %v2480_v15 = vrot.slane %v2475_v8, %v769_v7 }
 0x1e6   :  { %vm2395_vm4 = vcmp.ge.f32.partialorder %v3239_v16, 0.0  ;;  %v2399_v22 = vmul.f32 0.1, %v3239_v16  ;;  %v2229_v23 = vpop.f32.mrb[3].mxu0 }
 0x1e7   :  { %vm2396_vm5 = vcmp.ge.f32.partialorder %v3241_v18, 0.0  ;;  %v2400_v24 = vmul.f32 0.1, %v3241_v18 }
 0x1e8   :  { %v2403_v25 = vsel %vm2395_vm4, %v3239_v16, %v2399_v22 }
 0x1e9   :  { %v2404_v54 = vsel %vm2396_vm5, %v3241_v18, %v2400_v24  ;;  %v2407_v58 = vpack.c.bf16 %v2403_v25, %v2403_v25 }
 0x1ea   :  { %v2408_v55 = vpack.c.bf16 %v2404_v54, %v2404_v54 }
 0x1ec   :  { %2839 = vmatprep.mubr.bf16.mxu0 %v2408_v55 }
 0x1ed   :  { %2840 = vmatmul.mubr.bf16.vlgmr.msra.gmra.mrb[4].mxu0 %v2407_v58 }
 0x1ee   :  { %2849 = vmatpush1.bf16.msra.mxu0 %v3713_v61 }
 0x1ef   :  { %2850 = vmatprep.subr.bf16.mxu0 %v3718_v26 }
 0x1f2   :  { %2851 = vmatpush1.bf16.msra.mxu0 %v3716_v4 }
 0x1f3   :  { %2852 = vmatprep.subr.bf16.mxu0 %v3721_v5 }
 0x1f6   :  { %2853 = vmatpush1.bf16.msra.mxu0 %v3719_v10 }
 0x1f7   :  { %2854 = vmatprep.subr.bf16.mxu0 %v3724_v45 }
 0x1fa   :  { %2855 = vmatpush1.bf16.msra.mxu0 %v3722_v46 }
 0x1fb   :  { %2856 = vmatprep.subr.bf16.mxu0 %v3727_v28 }
 0x1fe   :  { %2857 = vmatpush1.bf16.msra.mxu0 %v3725_v33 }
 0x1ff   :  { %2858 = vmatprep.subr.bf16.mxu0 %v3730_v47 }
 0x202   :  { %2859 = vmatpush1.bf16.msra.mxu0 %v3728_v6 }
 0x203   :  { %2860 = vmatprep.subr.bf16.mxu0 %v3733_v20 }
 0x206   :  { %2861 = vmatpush1.bf16.msra.mxu0 %v3731_v29 }
 0x207   :  { %2862 = vmatprep.subr.bf16.mxu0 %v3736_v53 }
 0x20a   :  { %2863 = vmatpush1.bf16.msra.mxu0 %v3734_v62 }
 0x20b   :  { %2864 = vmatprep.subr.bf16.mxu0 %v3739_v38 }
 0x20e   :  { %2865 = vmatpush1.bf16.msra.mxu0 %v3737_v56 }
 0x20f   :  { %2866 = vmatprep.subr.bf16.mxu0 %v3742_v63 }
 0x212   :  { %2867 = vmatpush1.bf16.msra.mxu0 %v3740_v57 }
 0x213   :  { %2868 = vmatprep.subr.bf16.mxu0 %v3745_v9 }
 0x216   :  { %2869 = vmatpush1.bf16.msra.mxu0 %v3743_v59 }
 0x217   :  { %2870 = vmatprep.subr.bf16.mxu0 %v3748_v30 }
 0x21a   :  { %2871 = vmatpush1.bf16.msra.mxu0 %v3746_v1 }
 0x21b   :  { %2872 = vmatprep.subr.bf16.mxu0 %v3751_v31 }
 0x21e   :  { %2873 = vmatpush1.bf16.msra.mxu0 %v3749_v32 }
 0x21f   :  { %2874 = vmatprep.subr.bf16.mxu0 %v3754_v34 }
 0x222   :  { %2875 = vmatpush1.bf16.msra.mxu0 %v3752_v35 }
 0x223   :  { %2876 = vmatprep.subr.bf16.mxu0 %v3757_v36 }
 0x226   :  { %2877 = vmatpush1.bf16.msra.mxu0 %v3755_v37 }
 0x227   :  { %2878 = vmatprep.subr.bf16.mxu0 %v3760_v39 }
 0x22a   :  { %2879 = vmatpush1.bf16.msra.mxu0 %v3758_v40 }
 0x261   :  { %v2388_v44 = vpop.f32.mrb[4].mxu1 }
 0x262   :  { %v3242_v49 = vadd.f32 %v2388_v44, %v778_v42  ;;  %v2390_v50 = vpop.f32.mrb[5].mxu1 }
 0x263   :  { %v3243_v51 = vadd.f32 %v2390_v50, %v782_v43  ;;  %v2392_v52 = vpop.f32.mrb[6].mxu1 }
 0x264   :  { %vm2397_vm6 = vcmp.ge.f32.partialorder %v3242_v49, 0.0  ;;  %v2401_v60 = vmul.f32 0.1, %v3242_v49  ;;  %v2393_v0 = vpop.f32.mrb[7].mxu1 }
 0x265   :  { %vm2398_vm7 = vcmp.ge.f32.partialorder %v3243_v51, 0.0  ;;  %v2402_v2 = vmul.f32 0.1, %v3243_v51 }
 0x266   :  { %v2405_v3 = vsel %vm2397_vm6, %v3242_v49, %v2401_v60 }
 0x267   :  { %v2406_v12 = vsel %vm2398_vm7, %v3243_v51, %v2402_v2  ;;  %v2409_v14 = vpack.c.bf16 %v2405_v3, %v2405_v3 }
 0x268   :  { %v2410_v13 = vpack.c.bf16 %v2406_v12, %v2406_v12 }
 0x26a   :  { %2880 = vmatprep.mubr.bf16.mxu0 %v2410_v13 }
 0x26b   :  { %2881 = vmatmul.mubr.bf16.vlgmr.msra.gmra.mrb[4].mxu0 %v2409_v14 }
 0x33e   :  { %v2882_v16 = vpop.f32.mrb[4].mxu0 }
 0x33f   :  { %v3244_v17 = vadd.f32 %v2882_v16, %v2480_v15  ;;  %v2884_v18 = vpop.f32.mrb[5].mxu0 }
 0x340   :  { %v3245_v19 = vadd.f32 %v2884_v18, %v2484_v27  ;;  %v2886_v22 = vpop.f32.mrb[6].mxu0 }
 0x341   :  { %v2887_v23 = vpop.f32.mrb[7].mxu0 }
 0x342   :  { %v2891_v24 = vcombine.low %v3244_v17, %v3245_v19 }
 0x344   :  { %3237 = vst.sshfl [vmem:[#allocation9] sm:$0x33 pattern:$0x76325410] %v2891_v24 }
 0x345   :  { %3838 = shalt.err (!%p3835_p0)
}
 0x346   :  { %s3839_s14 = scalar_lea.hbm %s4088_s5, 64 }
 0x347   :  { %p3840_p1 = scmp.ne.s32.totalorder %s4088_s5, %s3839_s14  ;;  %p3843_p2 = scmp.lt.u32.totalorder %s3839_s14, %s4088_s5 }
 0x349   :  { %p3845_p3 = pnand %p3843_p2, %p3840_p1 }
 0x34b   :  { %3848 = shalt.err (!%p3845_p3)
}
 0x34c   :  { %2910 = dma.vmem_to_hbm [thread:$0]  %s2908_s11, 64, %s4088_s5, [#allocation5]  }
 0x34d   :  { %3853 = dma.done.wait [#allocation5], 64  }
 0x34e   :  { %3854 = vsyncadd [#allocation5], 4294967232 }
 0x34f   :  { %2914 = vsyncpa [#allocation4], 1 }
 0x350   :  { %2915 = vsyncpa [#allocation7], 1 }
 0x351   :  { %2916 = vsyncpa [#allocation5], 1 }

</bundles_post_ra>
